<compile_context>
chip_gen: v7x
topology: tpu7x:2x2x1
jax: 0.10.0
libtpu: 0.0.40
codegen_flags: <defaults>
</compile_context>

<pallas_src>
import functools

import jax
import jax.numpy as jnp
from jax.experimental import pallas as pl
from jax.experimental.pallas import tpu as pltpu

FEAT = 512        # string_to_num('level4') -> Linear(512, 11)
K_ATTN = 32       # External_attention.k
N_CLASSES = 11    # data='MUSIC'
D_FRAMES = 6      # External_attention(6) => channel dim of (B, D, F) must be 6

LANE = 128        # lane-padded logits width
NEG_INF = -1e30   # bias pad value -> padded classes vanish in log-softmax
TB_MAX = 48       # 6*TB = 288 MXU rows (v6e/v7x sweet spot, still fine on v5e)
TK_MAX = 2048     # K tile; sized so worst-case VMEM stays well under the limit


def _round_up(x, m):
    return (x + m - 1) // m * m


def _pick_tb(B):
    """Batch block: fill the MXU M-dim (6*TB rows) with no padded batches,
    preferring >=2 batch blocks (v7x megacore) when M stays >= 144."""
    tiles = (48, 40, 32, 24, 16, 8)
    for tb in tiles:                                   # megacore + good fill
        if tb >= 24 and B % tb == 0 and B >= 2 * tb:
            return tb
    for tb in tiles:                                   # largest no-padding tile
        if B % tb == 0:
            return tb
    if B <= TB_MAX:
        return B                                       # one full unpadded block
    nblk = -(-B // TB_MAX)                             # ragged large batch
    return _round_up(-(-B // nblk), 8)                 # pad only the tail block


def _pick_ktiling(K):
    """Returns (tk, K_pad, nk).  Small K: single block (w_vis VMEM-resident).
    Larger K: biggest power-of-two tile dividing K (no padding copies)."""
    if K <= TK_MAX:
        return K, K, 1
    for tk in (2048, 1024, 512, 256, 128):
        if K % tk == 0:
            return tk, K, K // tk
    # TODO(synk): mask the ragged last K tile in-kernel instead of padding x.
    k_pad = _round_up(K, TK_MAX)
    return TK_MAX, k_pad, k_pad // TK_MAX


# ---------------------------------------------------------------------------
# Fused kernel:
#   k-loop:   acc += x_blk(bf16) @ w_blk(bf16)              (f32 accumulate)
#   last k:   ReLU -> External_attention (as 2-D MXU dots with block-diagonal
#             weights) -> frame mean -> class layer -> LogSoftmax
#             -> lane-dense (TB, 128) store
# ---------------------------------------------------------------------------
def _make_kernel(tb):
    def kernel(x_ref, w_ref, g0_ref, g1_ref, gm_ref, wc_ref, bc_ref,
               o_ref, acc_ref):
        k = pl.program_id(1)

        @pl.when(k == 0)
        def _init():
            acc_ref[...] = jnp.zeros_like(acc_ref)

        # visual_net (synthetic linear): bf16 MXU inputs, f32 accumulation
        acc_ref[...] += jnp.dot(x_ref[...].astype(jnp.bfloat16), w_ref[...],
                                preferred_element_type=jnp.float32)

        @pl.when(k == pl.num_programs(1) - 1)
        def _epilogue():
            v = jnp.maximum(acc_ref[...], 0.0)                 # ReLU, (6*TB, 512)

            # Conv1d(6->32, kernel=1, no bias): one 2-D dot, G0 = I_TB (x) W0
            a = jnp.dot(g0_ref[...], v,
                        preferred_element_type=jnp.float32)    # (32*TB, 512)

            # softmax over the length dim (lanes); EUP reciprocal for the denom
            e = jnp.exp(a - jnp.max(a, axis=-1, keepdims=True))
            p = e * pl.reciprocal(jnp.sum(e, axis=-1, keepdims=True), approx=True)

            # attn / (1e-9 + attn.sum over the 32 channels)  -- exact division;
            # (TB*32,512) <-> (TB,32,512) reshapes are 8-sublane aligned.
            p3 = p.reshape(tb, K_ATTN, FEAT)
            pn = (p3 / (1e-9 + jnp.sum(p3, axis=1, keepdims=True))
                  ).reshape(tb * K_ATTN, FEAT)

            # Conv1d(32->6) + residual + ReLU:  G1 = I_TB (x) W1
            y = jnp.maximum(
                jnp.dot(g1_ref[...], pn,
                        preferred_element_type=jnp.float32) + v, 0.0)

            # torch.mean(v_fea, dim=1):  GM = I_TB (x) (ones(1,6)/6)
            feat = jnp.dot(gm_ref[...], y,
                           preferred_element_type=jnp.float32)  # (TB, 512)

            # class_layer (lane-padded to 128) + LogSoftmax(dim=1)
            logits = jnp.dot(feat, wc_ref[...],
                             preferred_element_type=jnp.float32) + bc_ref[...]
            lm = jnp.max(logits, axis=-1, keepdims=True)
            lse = lm + jnp.log(jnp.sum(jnp.exp(logits - lm), axis=-1,
                                       keepdims=True))
            o_ref[...] = (logits - lse).astype(o_ref.dtype)     # (TB, 128)

    return kernel


# ---------------------------------------------------------------------------
# One-time parameter preparation (no per-forward padding / weight expansion)
# ---------------------------------------------------------------------------
def prepare_params(params, batch_size, chw):
    tb = _pick_tb(batch_size)
    tk, k_pad, nk = _pick_ktiling(chw)

    eye = jnp.eye(tb, dtype=jnp.float32)
    w0 = params["w0"].astype(jnp.float32)                      # (32, 6)
    w1 = params["w1"].astype(jnp.float32)                      # (6, 32)
    gm_row = jnp.full((1, D_FRAMES), 1.0 / D_FRAMES, jnp.float32)

    wv = params["w_vis"].astype(jnp.bfloat16)                  # (K, 512)
    if k_pad != chw:                                           # rare ragged K
        wv = jnp.zeros((k_pad, FEAT), jnp.bfloat16).at[:chw].set(wv)

    weights = {
        "w_vis": wv,
        "g0": jnp.kron(eye, w0),                               # (32*TB, 6*TB)
        "g1": jnp.kron(eye, w1),                               # (6*TB, 32*TB)
        "gm": jnp.kron(eye, gm_row),                           # (TB,   6*TB)
        "wc": jnp.zeros((FEAT, LANE), jnp.float32)
                 .at[:, :N_CLASSES].set(params["wc"]),
        "bc": jnp.full((1, LANE), NEG_INF, jnp.float32)
                 .at[:, :N_CLASSES].set(params["bc"]),
    }
    cfg = {"tb": tb, "tk": tk, "k_pad": k_pad, "nk": nk}
    return weights, cfg


# ---------------------------------------------------------------------------
# Full forward
# ---------------------------------------------------------------------------
@functools.partial(jax.jit, static_argnames=("tb", "tk", "k_pad", "nk"))
def av_model_forward(v_input, weights, *, tb, tk, k_pad, nk):
    B, C, D, H, W = v_input.shape
    assert D == D_FRAMES, "External_attention(6) requires D == 6"
    K = C * H * W

    # matches torch .view(B*D, C, H, W) on a contiguous (B, C, D, H, W) tensor
    x = v_input.reshape(B * D_FRAMES, K)

    b_pad = _round_up(B, tb)
    if b_pad != B or k_pad != K:          # only the ragged fall-back path pads
        x = jnp.zeros((b_pad * D_FRAMES, k_pad), x.dtype
                      ).at[:B * D_FRAMES, :K].set(x)
    nb = b_pad // tb

    out = pl.pallas_call(
        _make_kernel(tb),
        out_shape=jax.ShapeDtypeStruct((b_pad, LANE), jnp.float32),
        grid_spec=pltpu.PrefetchScalarGridSpec(
            num_scalar_prefetch=0,
            grid=(nb, nk),                                     # K reduction last
            in_specs=[
                pl.BlockSpec((tb * D_FRAMES, tk), lambda b, k: (b, k)),      # x
                pl.BlockSpec((tk, FEAT), lambda b, k: (k, 0)),               # w_vis
                pl.BlockSpec((K_ATTN * tb, D_FRAMES * tb),
                             lambda b, k: (0, 0)),                           # G0
                pl.BlockSpec((D_FRAMES * tb, K_ATTN * tb),
                             lambda b, k: (0, 0)),                           # G1
                pl.BlockSpec((tb, D_FRAMES * tb), lambda b, k: (0, 0)),      # GM
                pl.BlockSpec((FEAT, LANE), lambda b, k: (0, 0)),             # wc
                pl.BlockSpec((1, LANE), lambda b, k: (0, 0)),                # bc
            ],
            out_specs=pl.BlockSpec((tb, LANE), lambda b, k: (b, 0)),
            scratch_shapes=[pltpu.VMEM((tb * D_FRAMES, FEAT), jnp.float32)],
        ),
        compiler_params=pltpu.CompilerParams(
            dimension_semantics=("parallel", "arbitrary"),
            # worst-case config (TB=48, tk=2048) ~30 MiB; 40 MiB leaves headroom
            # and stays inside v7x's 64 MiB physical VMEM.
            vmem_limit_bytes=40 * 1024 * 1024,
        ),
    )(x, weights["w_vis"], weights["g0"], weights["g1"], weights["gm"],
      weights["wc"], weights["bc"])

    return out[:B, :N_CLASSES]


# pure-JAX reference for verification (same bf16-rounded visual operands)
def av_model_reference(v_input, params):
    B, C, D, H, W = v_input.shape
    x = v_input.reshape(B * D, C * H * W)
    xb = x.astype(jnp.bfloat16).astype(jnp.float32)
    wv = params["w_vis"].astype(jnp.float32)
    v_fea = jnp.maximum(xb @ wv, 0.0).reshape(B, D, FEAT)
    attn = jnp.einsum("kc,bcf->bkf", params["w0"], v_fea)
    attn = jax.nn.softmax(attn, axis=-1)
    attn = attn / (1e-9 + jnp.sum(attn, axis=1, keepdims=True))
    y = jnp.maximum(jnp.einsum("ck,bkf->bcf", params["w1"], attn) + v_fea, 0.0)
    feat = jnp.mean(y, axis=1)
    logits = feat @ params["wc"] + params["bc"][0]
    return jax.nn.log_softmax(logits, axis=1)


def init_params(key, chw):
    k1, k2, k3, k4, k5 = jax.random.split(key, 5)
    return {
        # bf16 weight stream for the (HBM-bound) visual matmul
        "w_vis": (0.02 * jax.random.normal(k1, (chw, FEAT), jnp.float32)
                  ).astype(jnp.bfloat16),
        "w0": 0.1 * jax.random.normal(k2, (K_ATTN, D_FRAMES), jnp.float32),
        "w1": 0.1 * jax.random.normal(k3, (D_FRAMES, K_ATTN), jnp.float32),
        "wc": 0.05 * jax.random.normal(k4, (FEAT, N_CLASSES), jnp.float32),
        "bc": 0.01 * jax.random.normal(k5, (1, N_CLASSES), jnp.float32),
    }


if __name__ == "__main__":
    key = jax.random.PRNGKey(0)
    k_in, k_par = jax.random.split(key)

    B, C, D, H, W = 2, 3, D_FRAMES, 16, 16          # D must equal 6
    v_input = jax.random.normal(k_in, (B, C, D, H, W), jnp.float32)
    params = init_params(k_par, C * H * W)

    weights, cfg = prepare_params(params, B, C * H * W)   # one-time prep
    out = jax.block_until_ready(av_model_forward(v_input, weights, **cfg))

    ref = av_model_reference(v_input, params)
    assert out.shape == (B, N_CLASSES)
    # tolerance covers bf16 visual operands, MXU default matmul precision and
    # the approx-reciprocal softmax denominator
    assert jnp.allclose(out, ref, atol=1e-2, rtol=1e-2), "mismatch vs reference"

    print("KERNEL_OK")
</pallas_src>

<mosaic_0001>
module attributes {stable_mosaic.version = 11 : i64} {
  func.func @kernel(%arg0: i32, %arg1: i32, %arg2: memref<12x768xf32, #tpu.memory_space<vmem>>, %arg3: memref<768x512xbf16, #tpu.memory_space<vmem>>, %arg4: memref<64x12xf32, #tpu.memory_space<vmem>>, %arg5: memref<12x64xf32, #tpu.memory_space<vmem>>, %arg6: memref<2x12xf32, #tpu.memory_space<vmem>>, %arg7: memref<512x128xf32, #tpu.memory_space<vmem>>, %arg8: memref<1x128xf32, #tpu.memory_space<vmem>>, %arg9: memref<2x128xf32, #tpu.memory_space<vmem>>, %arg10: memref<12x512xf32, #tpu.memory_space<vmem>>) attributes {dimension_semantics = [#tpu.dimension_semantics<parallel>, #tpu.dimension_semantics<arbitrary>], iteration_bounds = array<i64: 1, 1>, scalar_prefetch = 0 : i64, scratch_operands = 1 : i64, tpu.core_type = #tpu.core_type<tc>, window_params = [{transform_indices = @transform_0, window_bounds = array<i64: 12, 768>}, {transform_indices = @transform_1, window_bounds = array<i64: 768, 512>}, {pipeline_mode = #tpu.pipeline_mode<synchronous>, transform_indices = @transform_2, window_bounds = array<i64: 64, 12>}, {pipeline_mode = #tpu.pipeline_mode<synchronous>, transform_indices = @transform_3, window_bounds = array<i64: 12, 64>}, {pipeline_mode = #tpu.pipeline_mode<synchronous>, transform_indices = @transform_4, window_bounds = array<i64: 2, 12>}, {pipeline_mode = #tpu.pipeline_mode<synchronous>, transform_indices = @transform_5, window_bounds = array<i64: 512, 128>}, {pipeline_mode = #tpu.pipeline_mode<synchronous>, transform_indices = @transform_6, window_bounds = array<i64: 1, 128>}, {transform_indices = @transform_7, window_bounds = array<i64: 2, 128>}]} {
    %c0_i32 = arith.constant 0 : i32
    %0 = arith.cmpi eq, %arg1, %c0_i32 : i32
    %1 = arith.extui %0 : i1 to i32
    %c0_i32_0 = arith.constant 0 : i32
    %2 = arith.cmpi ne, %1, %c0_i32_0 : i32
    scf.if %2 {
      %cst_10 = arith.constant 0.000000e+00 : f32
      %13 = vector.broadcast %cst_10 : f32 to vector<12x512xf32>
      %c0_11 = arith.constant 0 : index
      %c0_12 = arith.constant 0 : index
      %14 = vector.load %arg10[%c0_11, %c0_12] : memref<12x512xf32, #tpu.memory_space<vmem>>, vector<12x512xf32>
      tpu.vector_store %arg10[%c0_11, %c0_12], %13 {strides = array<i32>} : memref<12x512xf32, #tpu.memory_space<vmem>>, vector<12x512xf32>,
    } else {
    }
    %c0 = arith.constant 0 : index
    %c0_1 = arith.constant 0 : index
    %3 = vector.load %arg10[%c0, %c0_1] : memref<12x512xf32, #tpu.memory_space<vmem>>, vector<12x512xf32>
    %c0_2 = arith.constant 0 : index
    %c0_3 = arith.constant 0 : index
    %4 = vector.load %arg2[%c0_2, %c0_3] : memref<12x768xf32, #tpu.memory_space<vmem>>, vector<12x768xf32>
    %5 = arith.truncf %4 : vector<12x768xf32> to vector<12x768xbf16>
    %c0_4 = arith.constant 0 : index
    %c0_5 = arith.constant 0 : index
    %6 = vector.load %arg3[%c0_4, %c0_5] : memref<768x512xbf16, #tpu.memory_space<vmem>>, vector<768x512xbf16>
    %cst = arith.constant dense<0.000000e+00> : vector<12x512xf32>
    %7 = tpu.matmul %5, %6, %cst {dimension_numbers = #tpu.dot_dimension_numbers<[1], [0], [0], [1], [0, 0, 1, 1], [], []>} : vector<12x768xbf16>, vector<768x512xbf16>, vector<12x512xf32> -> vector<12x512xf32>
    %8 = arith.addf %3, %7 : vector<12x512xf32>
    %c0_6 = arith.constant 0 : index
    %c0_7 = arith.constant 0 : index
    %9 = vector.load %arg10[%c0_6, %c0_7] : memref<12x512xf32, #tpu.memory_space<vmem>>, vector<12x512xf32>
    tpu.vector_store %arg10[%c0_6, %c0_7], %8 {strides = array<i32>} : memref<12x512xf32, #tpu.memory_space<vmem>>, vector<12x512xf32>,
    %c0_i32_8 = arith.constant 0 : i32
    %10 = arith.cmpi eq, %arg1, %c0_i32_8 : i32
    %11 = arith.extui %10 : i1 to i32
    %c0_i32_9 = arith.constant 0 : i32
    %12 = arith.cmpi ne, %11, %c0_i32_9 : i32
    scf.if %12 {
      %c0_10 = arith.constant 0 : index
      %c0_11 = arith.constant 0 : index
      %13 = vector.load %arg10[%c0_10, %c0_11] : memref<12x512xf32, #tpu.memory_space<vmem>>, vector<12x512xf32>
      %cst_12 = arith.constant 0.000000e+00 : f32
      %14 = vector.broadcast %cst_12 : f32 to vector<12x512xf32>
      %15 = arith.maximumf %13, %14 : vector<12x512xf32>
      %c0_13 = arith.constant 0 : index
      %c0_14 = arith.constant 0 : index
      %16 = vector.load %arg4[%c0_13, %c0_14] : memref<64x12xf32, #tpu.memory_space<vmem>>, vector<64x12xf32>
      %cst_15 = arith.constant dense<0.000000e+00> : vector<64x512xf32>
      %17 = tpu.matmul %16, %15, %cst_15 {dimension_numbers = #tpu.dot_dimension_numbers<[1], [0], [0], [1], [0, 0, 1, 1], [], []>} : vector<64x12xf32>, vector<12x512xf32>, vector<64x512xf32> -> vector<64x512xf32>
      %cst_16 = arith.constant dense<0xFF800000> : vector<64xf32>
      %18 = vector.multi_reduction <maximumf>, %17, %cst_16 [1] : vector<64x512xf32> to vector<64xf32>
      %19 = vector.shape_cast %18 : vector<64xf32> to vector<64x1xf32>
      %20 = vector.broadcast %19 : vector<64x1xf32> to vector<64x512xf32>
      %21 = arith.subf %17, %20 : vector<64x512xf32>
      %22 = math.exp %21 : vector<64x512xf32>
      %cst_17 = arith.constant dense<0.000000e+00> : vector<64xf32>
      %23 = vector.multi_reduction <add>, %22, %cst_17 [1] : vector<64x512xf32> to vector<64xf32>
      %24 = vector.shape_cast %23 : vector<64xf32> to vector<64x1xf32>
      %25 = tpu.reciprocal %24 {approx = true} : vector<64x1xf32> -> vector<64x1xf32>
      %26 = vector.broadcast %25 : vector<64x1xf32> to vector<64x512xf32>
      %27 = arith.mulf %22, %26 : vector<64x512xf32>
      %28 = vector.shape_cast %27 : vector<64x512xf32> to vector<2x32x512xf32>
      %cst_18 = arith.constant dense<0.000000e+00> : vector<2x512xf32>
      %29 = vector.multi_reduction <add>, %28, %cst_18 [1] : vector<2x32x512xf32> to vector<2x512xf32>
      %30 = vector.shape_cast %29 : vector<2x512xf32> to vector<2x1x512xf32>
      %cst_19 = arith.constant 9.99999971E-10 : f32
      %31 = vector.broadcast %cst_19 : f32 to vector<2x1x512xf32>
      %32 = arith.addf %31, %30 : vector<2x1x512xf32>
      %33 = vector.broadcast %32 : vector<2x1x512xf32> to vector<2x32x512xf32>
      %34 = arith.divf %28, %33 : vector<2x32x512xf32>
      %35 = vector.shape_cast %34 : vector<2x32x512xf32> to vector<64x512xf32>
      %c0_20 = arith.constant 0 : index
      %c0_21 = arith.constant 0 : index
      %36 = vector.load %arg5[%c0_20, %c0_21] : memref<12x64xf32, #tpu.memory_space<vmem>>, vector<12x64xf32>
      %cst_22 = arith.constant dense<0.000000e+00> : vector<12x512xf32>
      %37 = tpu.matmul %36, %35, %cst_22 {dimension_numbers = #tpu.dot_dimension_numbers<[1], [0], [0], [1], [0, 0, 1, 1], [], []>} : vector<12x64xf32>, vector<64x512xf32>, vector<12x512xf32> -> vector<12x512xf32>
      %38 = arith.addf %37, %15 : vector<12x512xf32>
      %cst_23 = arith.constant 0.000000e+00 : f32
      %39 = vector.broadcast %cst_23 : f32 to vector<12x512xf32>
      %40 = arith.maximumf %38, %39 : vector<12x512xf32>
      %c0_24 = arith.constant 0 : index
      %c0_25 = arith.constant 0 : index
      %41 = vector.load %arg6[%c0_24, %c0_25] : memref<2x12xf32, #tpu.memory_space<vmem>>, vector<2x12xf32>
      %cst_26 = arith.constant dense<0.000000e+00> : vector<2x512xf32>
      %42 = tpu.matmul %41, %40, %cst_26 {dimension_numbers = #tpu.dot_dimension_numbers<[1], [0], [0], [1], [0, 0, 1, 1], [], []>} : vector<2x12xf32>, vector<12x512xf32>, vector<2x512xf32> -> vector<2x512xf32>
      %c0_27 = arith.constant 0 : index
      %c0_28 = arith.constant 0 : index
      %43 = vector.load %arg7[%c0_27, %c0_28] : memref<512x128xf32, #tpu.memory_space<vmem>>, vector<512x128xf32>
      %cst_29 = arith.constant dense<0.000000e+00> : vector<2x128xf32>
      %44 = tpu.matmul %42, %43, %cst_29 {dimension_numbers = #tpu.dot_dimension_numbers<[1], [0], [0], [1], [0, 0, 1, 1], [], []>} : vector<2x512xf32>, vector<512x128xf32>, vector<2x128xf32> -> vector<2x128xf32>
      %c0_30 = arith.constant 0 : index
      %c0_31 = arith.constant 0 : index
      %45 = vector.load %arg8[%c0_30, %c0_31] : memref<1x128xf32, #tpu.memory_space<vmem>>, vector<1x128xf32>
      %46 = vector.broadcast %45 : vector<1x128xf32> to vector<2x128xf32>
      %47 = arith.addf %44, %46 : vector<2x128xf32>
      %cst_32 = arith.constant dense<0xFF800000> : vector<2xf32>
      %48 = vector.multi_reduction <maximumf>, %47, %cst_32 [1] : vector<2x128xf32> to vector<2xf32>
      %49 = vector.shape_cast %48 : vector<2xf32> to vector<2x1xf32>
      %50 = vector.broadcast %49 : vector<2x1xf32> to vector<2x128xf32>
      %51 = arith.subf %47, %50 : vector<2x128xf32>
      %52 = math.exp %51 : vector<2x128xf32>
      %cst_33 = arith.constant dense<0.000000e+00> : vector<2xf32>
      %53 = vector.multi_reduction <add>, %52, %cst_33 [1] : vector<2x128xf32> to vector<2xf32>
      %54 = vector.shape_cast %53 : vector<2xf32> to vector<2x1xf32>
      %55 = math.log %54 : vector<2x1xf32>
      %56 = arith.addf %49, %55 : vector<2x1xf32>
      %57 = vector.broadcast %56 : vector<2x1xf32> to vector<2x128xf32>
      %58 = arith.subf %47, %57 : vector<2x128xf32>
      %c0_34 = arith.constant 0 : index
      %c0_35 = arith.constant 0 : index
      %59 = vector.load %arg9[%c0_34, %c0_35] : memref<2x128xf32, #tpu.memory_space<vmem>>, vector<2x128xf32>
      tpu.vector_store %arg9[%c0_34, %c0_35], %58 {strides = array<i32>} : memref<2x128xf32, #tpu.memory_space<vmem>>, vector<2x128xf32>,
    } else {
    }
    return
  }
  func.func @transform_0(%arg0: i32, %arg1: i32) -> (i32, i32) {
    %c0_i32 = arith.constant 0 : i32
    return %arg0, %arg1 : i32, i32
  }
  func.func @transform_1(%arg0: i32, %arg1: i32) -> (i32, i32) {
    %c0_i32 = arith.constant 0 : i32
    %c0_i32_0 = arith.constant 0 : i32
    return %arg1, %c0_i32 : i32, i32
  }
  func.func @transform_2(%arg0: i32, %arg1: i32) -> (i32, i32) {
    %c0_i32 = arith.constant 0 : i32
    %c0_i32_0 = arith.constant 0 : i32
    %c0_i32_1 = arith.constant 0 : i32
    return %c0_i32, %c0_i32_0 : i32, i32
  }
  func.func @transform_3(%arg0: i32, %arg1: i32) -> (i32, i32) {
    %c0_i32 = arith.constant 0 : i32
    %c0_i32_0 = arith.constant 0 : i32
    %c0_i32_1 = arith.constant 0 : i32
    return %c0_i32, %c0_i32_0 : i32, i32
  }
  func.func @transform_4(%arg0: i32, %arg1: i32) -> (i32, i32) {
    %c0_i32 = arith.constant 0 : i32
    %c0_i32_0 = arith.constant 0 : i32
    %c0_i32_1 = arith.constant 0 : i32
    return %c0_i32, %c0_i32_0 : i32, i32
  }
  func.func @transform_5(%arg0: i32, %arg1: i32) -> (i32, i32) {
    %c0_i32 = arith.constant 0 : i32
    %c0_i32_0 = arith.constant 0 : i32
    %c0_i32_1 = arith.constant 0 : i32
    return %c0_i32, %c0_i32_0 : i32, i32
  }
  func.func @transform_6(%arg0: i32, %arg1: i32) -> (i32, i32) {
    %c0_i32 = arith.constant 0 : i32
    %c0_i32_0 = arith.constant 0 : i32
    %c0_i32_1 = arith.constant 0 : i32
    return %c0_i32, %c0_i32_0 : i32, i32
  }
  func.func @transform_7(%arg0: i32, %arg1: i32) -> (i32, i32) {
    %c0_i32 = arith.constant 0 : i32
    %c0_i32_0 = arith.constant 0 : i32
    return %arg0, %c0_i32 : i32, i32
  }
}

</mosaic_0001>

<bundles_post_ra>
// kernel: av_model_forward.1
= control target key start
LH: loop header
LB: loop body
LE: loop exit
PB: predicated region body
PF: predicated region fallthrough
CT: control target
= control target key end

     0   :  { %12 = vsyncpa [#allocation4], 0  ;;  %s4411_s0 = inlined_call_operand.vmem [shape: f32[12,768], index: 0, kind: input, shape index: {}]   ;;  %s4412_s1 = inlined_call_operand.hbm [shape: bf16[768,512], index: 1, kind: input, shape index: {}]   ;;  %s4413_s2 = inlined_call_operand.vmem [shape: f32[64,12], index: 2, kind: input, shape index: {}]   ;;  %s4414_s3 = inlined_call_operand.vmem [shape: f32[12,64], index: 3, kind: input, shape index: {}]   ;;  %s4415_s4 = inlined_call_operand.vmem [shape: f32[2,12], index: 4, kind: input, shape index: {}]   ;;  %s4416_s5 = inlined_call_operand.vmem [shape: f32[512,128], index: 5, kind: input, shape index: {}]   ;;  %s4417_s6 = inlined_call_operand.vmem [shape: f32[1,128], index: 6, kind: input, shape index: {}]   ;;  %s4418_s7 = inlined_call_operand.hbm [shape: f32[2,128], index: 7, kind: output, shape index: {}]  }
   0x1   :  { %13 = vsyncpa [#allocation5], 0  ;;  %s3573_s24 = smov [#allocation3]   ;;  %s3525_s28 = scalar_lea.hbm %s4412_s1, 24576 }
   0x2   :  { %s21_s25 = sshll.u32 %s3573_s24, 4  ;;  %p3526_p0 = scmp.ne.s32.totalorder %s4412_s1, %s3525_s28  ;;  %s22_s25 = int_to_ptr.vmem [resolvable:$true] %s21_s25 }
   0x3   :  { %p3529_p1 = scmp.lt.u32.totalorder %s3525_s28, %s4412_s1 }
   0x5   :  { %p3531_p2 = pnand %p3529_p1, %p3526_p0 }
   0x7   :  { %3534 = shalt.err (!%p3531_p2)
}
   0x8   :  { %s3535_s10 = scalar_lea.vmem %s22_s25, 24576  ;;  %p3540_p4 = scmp.lt.s32.totalorder %s22_s25, %s22_s25 }
   0x9   :  { %p3536_p3 = scmp.ne.s32.totalorder %s22_s25, %s3535_s10  ;;  %p3541_p5 = scmp.lt.s32.totalorder %s3535_s10, %s3535_s10 }
   0xb   :  { %p3542_p6 = por %p3541_p5, %p3540_p4 }
   0xd   :  { %p3543_p7 = pnand %p3542_p6, %p3536_p3 }
   0xf   :  { %3546 = shalt.err (!%p3543_p7)
}
  0x10   :  { %s3574_s11 = smov 256   ;;  %s3575_s12 = smov 16  }
  0x11   :  { %27 = dma.hbm_to_vmem [thread:$0]  %s4412_s1, 24576, %s22_s25, [#allocation4], %s3574_s11, %s3574_s11, %s3575_s12  }
  0x12   :  { %3569 = dma.done.wait [#allocation4], 24576  }
  0x13   :  { %3570 = vsyncadd [#allocation4], 4294942720  ;;  %v3137_v0 = vld [vmem:[#allocation3 + $0x4] ss:$16 sps:$4 sm:$0xff]   ;;  %v3139_v1 = vld [vmem:[#allocation3 + $0xc] ss:$16 sps:$4 sm:$0xff]  }
  0x14   :  { %1231 = vmatprep.subr.bf16.mxu0 %v3137_v0  ;;  %v3141_v2 = vld [vmem:[#allocation3] ss:$16 sps:$4 sm:$0xff]   ;;  %v3142_v3 = vld [vmem:[#allocation3 + $0x8] ss:$16 sps:$4 sm:$0xff]   ;;  %1360 = vmatprep.subr.bf16.mxu1 %v3139_v1  ;;  %v3143_v4 = vld [vmem:[#allocation3 + $0x24] ss:$16 sps:$4 sm:$0xff]  }
  0x15   :  { %1232 = vmatpush1.bf16.msra.mxu0 %v3141_v2  ;;  %1361 = vmatpush1.bf16.msra.mxu1 %v3142_v3  ;;  %v3145_v5 = vld [vmem:[#allocation3 + $0x2c] ss:$16 sps:$4 sm:$0xff]   ;;  %v3147_v6 = vld [vmem:[#allocation3 + $0x20] ss:$16 sps:$4 sm:$0xff]   ;;  %v3148_v7 = vld [vmem:[#allocation3 + $0x28] ss:$16 sps:$4 sm:$0xff]  }
  0x16   :  { %1233 = vmatprep.subr.bf16.mxu0 %v3143_v4  ;;  %1362 = vmatprep.subr.bf16.mxu1 %v3145_v5  ;;  %v3149_v8 = vld [vmem:[#allocation3 + $0x44] ss:$16 sps:$4 sm:$0xff]   ;;  %v3151_v9 = vld [vmem:[#allocation3 + $0x4c] ss:$16 sps:$4 sm:$0xff]   ;;  %v3153_v10 = vld [vmem:[#allocation3 + $0x40] ss:$16 sps:$4 sm:$0xff]  }
  0x17   :  { %v3154_v11 = vld [vmem:[#allocation3 + $0x48] ss:$16 sps:$4 sm:$0xff]   ;;  %v3155_v12 = vld [vmem:[#allocation3 + $0x64] ss:$16 sps:$4 sm:$0xff]   ;;  %v3157_v13 = vld [vmem:[#allocation3 + $0x6c] ss:$16 sps:$4 sm:$0xff]  }
  0x18   :  { %v3159_v14 = vld [vmem:[#allocation3 + $0x60] ss:$16 sps:$4 sm:$0xff]   ;;  %v3160_v15 = vld [vmem:[#allocation3 + $0x68] ss:$16 sps:$4 sm:$0xff]   ;;  %v3161_v16 = vld [vmem:[#allocation3 + $0x84] ss:$16 sps:$4 sm:$0xff]  }
  0x19   :  { %1234 = vmatpush1.bf16.msra.mxu0 %v3147_v6  ;;  %1363 = vmatpush1.bf16.msra.mxu1 %v3148_v7  ;;  %v3163_v17 = vld [vmem:[#allocation3 + $0x8c] ss:$16 sps:$4 sm:$0xff]   ;;  %v3165_v18 = vld [vmem:[#allocation3 + $0x80] ss:$16 sps:$4 sm:$0xff]   ;;  %v3166_v19 = vld [vmem:[#allocation3 + $0x88] ss:$16 sps:$4 sm:$0xff]  }
  0x1a   :  { %1235 = vmatprep.subr.bf16.mxu0 %v3149_v8  ;;  %1364 = vmatprep.subr.bf16.mxu1 %v3151_v9  ;;  %v3167_v20 = vld [vmem:[#allocation3 + $0xa4] ss:$16 sps:$4 sm:$0xff]   ;;  %v3169_v21 = vld [vmem:[#allocation3 + $0xac] ss:$16 sps:$4 sm:$0xff]   ;;  %v3171_v22 = vld [vmem:[#allocation3 + $0xa0] ss:$16 sps:$4 sm:$0xff]  }
  0x1b   :  { %v3172_v23 = vld [vmem:[#allocation3 + $0xa8] ss:$16 sps:$4 sm:$0xff]   ;;  %v3173_v24 = vld [vmem:[#allocation3 + $0xc4] ss:$16 sps:$4 sm:$0xff]   ;;  %v3175_v25 = vld [vmem:[#allocation3 + $0xcc] ss:$16 sps:$4 sm:$0xff]  }
  0x1c   :  { %v3177_v26 = vld [vmem:[#allocation3 + $0xc0] ss:$16 sps:$4 sm:$0xff]   ;;  %v3178_v27 = vld [vmem:[#allocation3 + $0xc8] ss:$16 sps:$4 sm:$0xff]   ;;  %v3179_v28 = vld [vmem:[#allocation3 + $0xe4] ss:$16 sps:$4 sm:$0xff]  }
  0x1d   :  { %1236 = vmatpush1.bf16.msra.mxu0 %v3153_v10  ;;  %1365 = vmatpush1.bf16.msra.mxu1 %v3154_v11  ;;  %v3181_v29 = vld [vmem:[#allocation3 + $0xec] ss:$16 sps:$4 sm:$0xff]   ;;  %v3183_v30 = vld [vmem:[#allocation3 + $0xe0] ss:$16 sps:$4 sm:$0xff]   ;;  %v3184_v31 = vld [vmem:[#allocation3 + $0xe8] ss:$16 sps:$4 sm:$0xff]  }
  0x1e   :  { %1237 = vmatprep.subr.bf16.mxu0 %v3155_v12  ;;  %1366 = vmatprep.subr.bf16.mxu1 %v3157_v13  ;;  %v3185_v32 = vld [vmem:[#allocation3 + $0x104] ss:$16 sps:$4 sm:$0xff]   ;;  %v3187_v33 = vld [vmem:[#allocation3 + $0x10c] ss:$16 sps:$4 sm:$0xff]   ;;  %v3189_v34 = vld [vmem:[#allocation3 + $0x100] ss:$16 sps:$4 sm:$0xff]  }
  0x1f   :  { %v3190_v35 = vld [vmem:[#allocation3 + $0x108] ss:$16 sps:$4 sm:$0xff]   ;;  %v3191_v36 = vld [vmem:[#allocation3 + $0x124] ss:$16 sps:$4 sm:$0xff]   ;;  %v3193_v37 = vld [vmem:[#allocation3 + $0x12c] ss:$16 sps:$4 sm:$0xff]  }
  0x20   :  { %v3195_v38 = vld [vmem:[#allocation3 + $0x120] ss:$16 sps:$4 sm:$0xff]   ;;  %v3196_v39 = vld [vmem:[#allocation3 + $0x128] ss:$16 sps:$4 sm:$0xff]   ;;  %v3197_v40 = vld [vmem:[#allocation3 + $0x144] ss:$16 sps:$4 sm:$0xff]  }
  0x21   :  { %1238 = vmatpush1.bf16.msra.mxu0 %v3159_v14  ;;  %1367 = vmatpush1.bf16.msra.mxu1 %v3160_v15  ;;  %v3199_v41 = vld [vmem:[#allocation3 + $0x14c] ss:$16 sps:$4 sm:$0xff]   ;;  %v3201_v42 = vld [vmem:[#allocation3 + $0x140] ss:$16 sps:$4 sm:$0xff]   ;;  %v3202_v43 = vld [vmem:[#allocation3 + $0x148] ss:$16 sps:$4 sm:$0xff]  }
  0x22   :  { %1239 = vmatprep.subr.bf16.mxu0 %v3161_v16  ;;  %1368 = vmatprep.subr.bf16.mxu1 %v3163_v17  ;;  %v3203_v44 = vld [vmem:[#allocation3 + $0x164] ss:$16 sps:$4 sm:$0xff]   ;;  %v3205_v45 = vld [vmem:[#allocation3 + $0x16c] ss:$16 sps:$4 sm:$0xff]   ;;  %v68_v47 = vld [vmem:[%s4411_s0 + $0x38] sm:$0xf] }
  0x23   :  { %v62_v46 = vld [vmem:[%s4411_s0 + $0x8] sm:$0xff]  ;;  %v3207_v48 = vld [vmem:[#allocation3 + $0x160] ss:$16 sps:$4 sm:$0xff]   ;;  %v3209_v51 = vld [vmem:[#allocation3 + $0x184] ss:$16 sps:$4 sm:$0xff]   ;;  %v4427_v15 = vmov 0.0  }
  0x24   :  { %v3208_v49 = vld [vmem:[#allocation3 + $0x168] ss:$16 sps:$4 sm:$0xff]   ;;  %v74_v50 = vpack.c.bf16 %v68_v47, %v62_v46  ;;  %v3211_v52 = vld [vmem:[#allocation3 + $0x18c] ss:$16 sps:$4 sm:$0xff]   ;;  %v3213_v53 = vld [vmem:[#allocation3 + $0x180] ss:$16 sps:$4 sm:$0xff]  }
  0x25   :  { %1240 = vmatpush1.bf16.msra.mxu0 %v3165_v18  ;;  %1369 = vmatpush1.bf16.msra.mxu1 %v3166_v19  ;;  %v3214_v54 = vld [vmem:[#allocation3 + $0x188] ss:$16 sps:$4 sm:$0xff]   ;;  %v3215_v55 = vld [vmem:[#allocation3 + $0x1a4] ss:$16 sps:$4 sm:$0xff]   ;;  %v3217_v56 = vld [vmem:[#allocation3 + $0x1ac] ss:$16 sps:$4 sm:$0xff]  }
  0x26   :  { %1241 = vmatprep.subr.bf16.mxu0 %v3167_v20  ;;  %1370 = vmatprep.subr.bf16.mxu1 %v3169_v21  ;;  %v3219_v57 = vld [vmem:[#allocation3 + $0x1a0] ss:$16 sps:$4 sm:$0xff]   ;;  %v3220_v58 = vld [vmem:[#allocation3 + $0x1a8] ss:$16 sps:$4 sm:$0xff]   ;;  %v3221_v59 = vld [vmem:[#allocation3 + $0x1c4] ss:$16 sps:$4 sm:$0xff]  }
  0x27   :  { %1263 = vmatprep.mubr.bf16.mxu0 %v74_v50  ;;  %1392 = vmatprep.mubr.bf16.mxu1 %v74_v50  ;;  %v3223_v60 = vld [vmem:[#allocation3 + $0x1cc] ss:$16 sps:$4 sm:$0xff]   ;;  %v3225_v61 = vld [vmem:[#allocation3 + $0x1c0] ss:$16 sps:$4 sm:$0xff]   ;;  %v3226_v62 = vld [vmem:[#allocation3 + $0x1c8] ss:$16 sps:$4 sm:$0xff]  }
  0x28   :  { %v3227_v63 = vld [vmem:[#allocation3 + $0x1e4] ss:$16 sps:$4 sm:$0xff]   ;;  %v3229_v0 = vld [vmem:[#allocation3 + $0x1ec] ss:$16 sps:$4 sm:$0xff]   ;;  %v3231_v1 = vld [vmem:[#allocation3 + $0x1e0] ss:$16 sps:$4 sm:$0xff]  }
  0x29   :  { %1242 = vmatpush1.bf16.msra.mxu0 %v3171_v22  ;;  %1371 = vmatpush1.bf16.msra.mxu1 %v3172_v23  ;;  %v3232_v2 = vld [vmem:[#allocation3 + $0x1e8] ss:$16 sps:$4 sm:$0xff]   ;;  %v3235_v3 = vld [vmem:[#allocation3 + $0x204] ss:$16 sps:$4 sm:$0xff]   ;;  %v67_v5 = vld [vmem:[%s4411_s0 + $0x30] sm:$0xf] }
  0x2a   :  { %1243 = vmatprep.subr.bf16.mxu0 %v3173_v24  ;;  %1372 = vmatprep.subr.bf16.mxu1 %v3175_v25  ;;  %v61_v4 = vld [vmem:[%s4411_s0] sm:$0xff]  ;;  %v3238_v6 = vld [vmem:[#allocation3 + $0x20c] ss:$16 sps:$4 sm:$0xff]   ;;  %v3236_v8 = vld [vmem:[#allocation3 + $0x208] ss:$16 sps:$4 sm:$0xff]   ;;  %vm1557_vm0 = vcmask 1043456  }
  0x2b   :  { %v3233_v7 = vld [vmem:[#allocation3 + $0x200] ss:$16 sps:$4 sm:$0xff]   ;;  %v73_v9 = vpack.c.bf16 %v67_v5, %v61_v4  ;;  %v3241_v10 = vld [vmem:[#allocation3 + $0x224] ss:$16 sps:$4 sm:$0xff]   ;;  %v3244_v11 = vld [vmem:[#allocation3 + $0x22c] ss:$16 sps:$4 sm:$0xff]  }
  0x2c   :  { %v3239_v12 = vld [vmem:[#allocation3 + $0x220] ss:$16 sps:$4 sm:$0xff]   ;;  %v3242_v13 = vld [vmem:[#allocation3 + $0x228] ss:$16 sps:$4 sm:$0xff]   ;;  %v3247_v14 = vld [vmem:[#allocation3 + $0x244] ss:$16 sps:$4 sm:$0xff]  }
  0x2d   :  { %1244 = vmatpush1.bf16.msra.mxu0 %v3177_v26  ;;  %1373 = vmatpush1.bf16.msra.mxu1 %v3178_v27  ;;  %49 = vst [vmem:[#allocation2 + $0x20] sm:$0xf] %v4427_v15  ;;  %50 = vst [vmem:[#allocation2 + $0x28] sm:$0xf] %v4427_v15  ;;  %v3250_v16 = vld [vmem:[#allocation3 + $0x24c] ss:$16 sps:$4 sm:$0xff]  }
  0x2e   :  { %1245 = vmatprep.subr.bf16.mxu0 %v3179_v28  ;;  %1374 = vmatprep.subr.bf16.mxu1 %v3181_v29  ;;  %51 = vst [vmem:[#allocation2 + $0x30] sm:$0xf] %v4427_v15  ;;  %52 = vst [vmem:[#allocation2 + $0x38] sm:$0xf] %v4427_v15  ;;  %v3245_v17 = vld [vmem:[#allocation3 + $0x240] ss:$16 sps:$4 sm:$0xff]  }
  0x2f   :  { %v3248_v18 = vld [vmem:[#allocation3 + $0x248] ss:$16 sps:$4 sm:$0xff]   ;;  %v3253_v19 = vld [vmem:[#allocation3 + $0x264] ss:$16 sps:$4 sm:$0xff]   ;;  %v3256_v20 = vld [vmem:[#allocation3 + $0x26c] ss:$16 sps:$4 sm:$0xff]  }
  0x30   :  { %v3251_v21 = vld [vmem:[#allocation3 + $0x260] ss:$16 sps:$4 sm:$0xff]   ;;  %v3254_v22 = vld [vmem:[#allocation3 + $0x268] ss:$16 sps:$4 sm:$0xff]   ;;  %v3259_v23 = vld [vmem:[#allocation3 + $0x284] ss:$16 sps:$4 sm:$0xff]  }
  0x31   :  { %1246 = vmatpush1.bf16.msra.mxu0 %v3183_v30  ;;  %1375 = vmatpush1.bf16.msra.mxu1 %v3184_v31  ;;  %v3262_v24 = vld [vmem:[#allocation3 + $0x28c] ss:$16 sps:$4 sm:$0xff]   ;;  %v3257_v25 = vld [vmem:[#allocation3 + $0x280] ss:$16 sps:$4 sm:$0xff]   ;;  %v3260_v26 = vld [vmem:[#allocation3 + $0x288] ss:$16 sps:$4 sm:$0xff]  }
  0x32   :  { %1247 = vmatprep.subr.bf16.mxu0 %v3185_v32  ;;  %1376 = vmatprep.subr.bf16.mxu1 %v3187_v33  ;;  %v3265_v27 = vld [vmem:[#allocation3 + $0x2a4] ss:$16 sps:$4 sm:$0xff]   ;;  %v3268_v28 = vld [vmem:[#allocation3 + $0x2ac] ss:$16 sps:$4 sm:$0xff]   ;;  %v3263_v29 = vld [vmem:[#allocation3 + $0x2a0] ss:$16 sps:$4 sm:$0xff]  }
  0x33   :  { %v3266_v30 = vld [vmem:[#allocation3 + $0x2a8] ss:$16 sps:$4 sm:$0xff]   ;;  %v3271_v31 = vld [vmem:[#allocation3 + $0x2c4] ss:$16 sps:$4 sm:$0xff]   ;;  %v3274_v32 = vld [vmem:[#allocation3 + $0x2cc] ss:$16 sps:$4 sm:$0xff]  }
  0x34   :  { %v64_v33 = vld [vmem:[%s4411_s0 + $0x18] sm:$0xff]  ;;  %v3289_v46 = vld [vmem:[#allocation3 + $0x324] ss:$16 sps:$4 sm:$0xff]   ;;  %v3317_v4 = vld [vmem:[#allocation3 + $0x3c0] ss:$16 sps:$4 sm:$0xff]   ;;  %vm3577_vm1 = vmmov 1  }
  0x35   :  { %1248 = vmatpush1.bf16.msra.mxu0 %v3189_v34  ;;  %1377 = vmatpush1.bf16.msra.mxu1 %v3190_v35  ;;  %v70_v34 = vld [vmem:[%s4411_s0 + $0x48] sm:$0xf]  ;;  %v3269_v35 = vld [vmem:[#allocation3 + $0x2c0] ss:$16 sps:$4 sm:$0xff]   ;;  %v3292_v47 = vld [vmem:[#allocation3 + $0x32c] ss:$16 sps:$4 sm:$0xff]  }
  0x36   :  { %1249 = vmatprep.subr.bf16.mxu0 %v3191_v36  ;;  %1378 = vmatprep.subr.bf16.mxu1 %v3193_v37  ;;  %v3272_v36 = vld [vmem:[#allocation3 + $0x2c8] ss:$16 sps:$4 sm:$0xff]   ;;  %v76_v37 = vpack.c.bf16 %v70_v34, %v64_v33  ;;  %v3295_v50 = vld [vmem:[#allocation3 + $0x344] ss:$16 sps:$4 sm:$0xff]   ;;  %v3358_v34 = vld [vmem:[#allocation3 + $0x48c] ss:$16 sps:$4 sm:$0xff]  }
  0x37   :  { %v3320_v5 = vld [vmem:[#allocation3 + $0x3c8] ss:$16 sps:$4 sm:$0xff]   ;;  %v3355_v33 = vld [vmem:[#allocation3 + $0x484] ss:$16 sps:$4 sm:$0xff]   ;;  %vm3695_vm2 = vmpackc.low %vm1557_vm0, %vm3577_vm1  ;;  %vm1532_vm3 = vcmask 97280   ;;  %vm2134_vm4 = vcmask 523264  }
  0x38   :  { %vm2672_vm5 = vcmask 1041408  }
  0x39   :  { %1250 = vmatpush1.bf16.msra.mxu0 %v3195_v38  ;;  %1379 = vmatpush1.bf16.msra.mxu1 %v3196_v39  ;;  %v3277_v38 = vld [vmem:[#allocation3 + $0x2e4] ss:$16 sps:$4 sm:$0xff]   ;;  %v3280_v39 = vld [vmem:[#allocation3 + $0x2ec] ss:$16 sps:$4 sm:$0xff]  }
  0x3a   :  { %1251 = vmatprep.subr.bf16.mxu0 %v3197_v40  ;;  %1380 = vmatprep.subr.bf16.mxu1 %v3199_v41  ;;  %v3275_v40 = vld [vmem:[#allocation3 + $0x2e0] ss:$16 sps:$4 sm:$0xff]   ;;  %v3278_v41 = vld [vmem:[#allocation3 + $0x2e8] ss:$16 sps:$4 sm:$0xff]  }
  0x3d   :  { %1252 = vmatpush1.bf16.msra.mxu0 %v3201_v42  ;;  %1381 = vmatpush1.bf16.msra.mxu1 %v3202_v43  ;;  %v3283_v42 = vld [vmem:[#allocation3 + $0x304] ss:$16 sps:$4 sm:$0xff]   ;;  %v3286_v43 = vld [vmem:[#allocation3 + $0x30c] ss:$16 sps:$4 sm:$0xff]  }
  0x3e   :  { %1253 = vmatprep.subr.bf16.mxu0 %v3203_v44  ;;  %1382 = vmatprep.subr.bf16.mxu1 %v3205_v45  ;;  %v3281_v44 = vld [vmem:[#allocation3 + $0x300] ss:$16 sps:$4 sm:$0xff]   ;;  %v3284_v45 = vld [vmem:[#allocation3 + $0x308] ss:$16 sps:$4 sm:$0xff]  }
  0x41   :  { %1254 = vmatpush1.bf16.msra.mxu0 %v3207_v48  ;;  %1383 = vmatpush1.bf16.msra.mxu1 %v3208_v49  ;;  %v3287_v48 = vld [vmem:[#allocation3 + $0x320] ss:$16 sps:$4 sm:$0xff]   ;;  %v3290_v49 = vld [vmem:[#allocation3 + $0x328] ss:$16 sps:$4 sm:$0xff]  }
  0x42   :  { %1255 = vmatprep.subr.bf16.mxu0 %v3209_v51  ;;  %1384 = vmatprep.subr.bf16.mxu1 %v3211_v52  ;;  %v3298_v51 = vld [vmem:[#allocation3 + $0x34c] ss:$16 sps:$4 sm:$0xff]   ;;  %v3293_v52 = vld [vmem:[#allocation3 + $0x340] ss:$16 sps:$4 sm:$0xff]  }
  0x45   :  { %1256 = vmatpush1.bf16.msra.mxu0 %v3213_v53  ;;  %1385 = vmatpush1.bf16.msra.mxu1 %v3214_v54  ;;  %v3296_v53 = vld [vmem:[#allocation3 + $0x348] ss:$16 sps:$4 sm:$0xff]   ;;  %v3301_v54 = vld [vmem:[#allocation3 + $0x364] ss:$16 sps:$4 sm:$0xff]  }
  0x46   :  { %1257 = vmatprep.subr.bf16.mxu0 %v3215_v55  ;;  %1386 = vmatprep.subr.bf16.mxu1 %v3217_v56  ;;  %v3304_v55 = vld [vmem:[#allocation3 + $0x36c] ss:$16 sps:$4 sm:$0xff]   ;;  %v3299_v56 = vld [vmem:[#allocation3 + $0x360] ss:$16 sps:$4 sm:$0xff]  }
  0x49   :  { %1258 = vmatpush1.bf16.msra.mxu0 %v3219_v57  ;;  %1387 = vmatpush1.bf16.msra.mxu1 %v3220_v58  ;;  %v3302_v57 = vld [vmem:[#allocation3 + $0x368] ss:$16 sps:$4 sm:$0xff]   ;;  %v3307_v58 = vld [vmem:[#allocation3 + $0x384] ss:$16 sps:$4 sm:$0xff]  }
  0x4a   :  { %1259 = vmatprep.subr.bf16.mxu0 %v3221_v59  ;;  %1388 = vmatprep.subr.bf16.mxu1 %v3223_v60  ;;  %v3310_v59 = vld [vmem:[#allocation3 + $0x38c] ss:$16 sps:$4 sm:$0xff]   ;;  %v3305_v60 = vld [vmem:[#allocation3 + $0x380] ss:$16 sps:$4 sm:$0xff]  }
  0x4d   :  { %1260 = vmatpush1.bf16.msra.mxu0 %v3225_v61  ;;  %1389 = vmatpush1.bf16.msra.mxu1 %v3226_v62  ;;  %v3308_v61 = vld [vmem:[#allocation3 + $0x388] ss:$16 sps:$4 sm:$0xff]   ;;  %v3313_v62 = vld [vmem:[#allocation3 + $0x3a4] ss:$16 sps:$4 sm:$0xff]  }
  0x4e   :  { %1261 = vmatprep.subr.bf16.mxu0 %v3227_v63  ;;  %1390 = vmatprep.subr.bf16.mxu1 %v3229_v0  ;;  %v3316_v63 = vld [vmem:[#allocation3 + $0x3ac] ss:$16 sps:$4 sm:$0xff]   ;;  %v3311_v0 = vld [vmem:[#allocation3 + $0x3a0] ss:$16 sps:$4 sm:$0xff]  }
  0x51   :  { %1262 = vmatpush1.bf16.msra.mxu0 %v3231_v1  ;;  %1391 = vmatpush1.bf16.msra.mxu1 %v3232_v2  ;;  %v3314_v1 = vld [vmem:[#allocation3 + $0x3a8] ss:$16 sps:$4 sm:$0xff]   ;;  %v3319_v2 = vld [vmem:[#allocation3 + $0x3c4] ss:$16 sps:$4 sm:$0xff]  }
  0x52   :  { %1274 = vmatprep.subr.bf16.mxu0 %v3235_v3  ;;  %1403 = vmatprep.subr.bf16.mxu1 %v3238_v6  ;;  %v3322_v3 = vld [vmem:[#allocation3 + $0x3cc] ss:$16 sps:$4 sm:$0xff]   ;;  %v3325_v6 = vld [vmem:[#allocation3 + $0x3e4] ss:$16 sps:$4 sm:$0xff]  }
  0x54   :  { %1264 = vmatmul.mubr.bf16.vlgmr.msra.gmra.mrb[0].mxu0 %v73_v9  ;;  %1393 = vmatmul.mubr.bf16.vlgmr.msra.gmra.mrb[0].mxu1 %v73_v9  ;;  %v3326_v9 = vld [vmem:[#allocation3 + $0x3e8] ss:$16 sps:$4 sm:$0xff]  }
  0x55   :  { %1275 = vmatpush1.bf16.msra.mxu0 %v3233_v7  ;;  %1404 = vmatpush1.bf16.msra.mxu1 %v3236_v8  ;;  %v3328_v7 = vld [vmem:[#allocation3 + $0x3ec] ss:$16 sps:$4 sm:$0xff]   ;;  %v3323_v8 = vld [vmem:[#allocation3 + $0x3e0] ss:$16 sps:$4 sm:$0xff]  }
  0x56   :  { %1276 = vmatprep.subr.bf16.mxu0 %v3241_v10  ;;  %1405 = vmatprep.subr.bf16.mxu1 %v3244_v11  ;;  %v3331_v10 = vld [vmem:[#allocation3 + $0x404] ss:$16 sps:$4 sm:$0xff]  }
  0x57   :  { %1306 = vmatprep.mubr.bf16.mxu0 %v76_v37  ;;  %1435 = vmatprep.mubr.bf16.mxu1 %v76_v37  ;;  %v63_v11 = vld [vmem:[%s4411_s0 + $0x10] sm:$0xff] }
  0x58   :  { %v3361_v37 = vld [vmem:[#allocation3 + $0x4a4] ss:$16 sps:$4 sm:$0xff]  }
  0x59   :  { %1277 = vmatpush1.bf16.msra.mxu0 %v3239_v12  ;;  %1406 = vmatpush1.bf16.msra.mxu1 %v3242_v13  ;;  %v69_v12 = vld [vmem:[%s4411_s0 + $0x40] sm:$0xf]  ;;  %v3334_v13 = vld [vmem:[#allocation3 + $0x40c] ss:$16 sps:$4 sm:$0xff]  }
  0x5a   :  { %1278 = vmatprep.subr.bf16.mxu0 %v3247_v14  ;;  %1407 = vmatprep.subr.bf16.mxu1 %v3250_v16  ;;  %v3329_v14 = vld [vmem:[#allocation3 + $0x400] ss:$16 sps:$4 sm:$0xff]   ;;  %v3332_v16 = vld [vmem:[#allocation3 + $0x408] ss:$16 sps:$4 sm:$0xff]  }
  0x5d   :  { %1279 = vmatpush1.bf16.msra.mxu0 %v3245_v17  ;;  %1408 = vmatpush1.bf16.msra.mxu1 %v3248_v18  ;;  %v75_v17 = vpack.c.bf16 %v69_v12, %v63_v11  ;;  %v3337_v18 = vld [vmem:[#allocation3 + $0x424] ss:$16 sps:$4 sm:$0xff]   ;;  %v3413_v11 = vld [vmem:[#allocation3 + $0x5c0] ss:$16 sps:$4 sm:$0xff]   ;;  %v3416_v12 = vld [vmem:[#allocation3 + $0x5c8] ss:$16 sps:$4 sm:$0xff]  }
  0x5e   :  { %1280 = vmatprep.subr.bf16.mxu0 %v3253_v19  ;;  %1409 = vmatprep.subr.bf16.mxu1 %v3256_v20  ;;  %v3340_v19 = vld [vmem:[#allocation3 + $0x42c] ss:$16 sps:$4 sm:$0xff]  }
  0x5f   :  { %v66_v20 = vld [vmem:[%s4411_s0 + $0x28] sm:$0xff] }
  0x61   :  { %1281 = vmatpush1.bf16.msra.mxu0 %v3251_v21  ;;  %1410 = vmatpush1.bf16.msra.mxu1 %v3254_v22  ;;  %v72_v21 = vld [vmem:[%s4411_s0 + $0x58] sm:$0xf]  ;;  %v3335_v22 = vld [vmem:[#allocation3 + $0x420] ss:$16 sps:$4 sm:$0xff]  }
  0x62   :  { %1282 = vmatprep.subr.bf16.mxu0 %v3259_v23  ;;  %1411 = vmatprep.subr.bf16.mxu1 %v3262_v24  ;;  %v3338_v23 = vld [vmem:[#allocation3 + $0x428] ss:$16 sps:$4 sm:$0xff]   ;;  %v78_v24 = vpack.c.bf16 %v72_v21, %v66_v20 }
  0x65   :  { %1283 = vmatpush1.bf16.msra.mxu0 %v3257_v25  ;;  %1412 = vmatpush1.bf16.msra.mxu1 %v3260_v26  ;;  %v3343_v25 = vld [vmem:[#allocation3 + $0x444] ss:$16 sps:$4 sm:$0xff]   ;;  %v3346_v26 = vld [vmem:[#allocation3 + $0x44c] ss:$16 sps:$4 sm:$0xff]  }
  0x66   :  { %1284 = vmatprep.subr.bf16.mxu0 %v3265_v27  ;;  %1413 = vmatprep.subr.bf16.mxu1 %v3268_v28  ;;  %v3341_v27 = vld [vmem:[#allocation3 + $0x440] ss:$16 sps:$4 sm:$0xff]   ;;  %v3344_v28 = vld [vmem:[#allocation3 + $0x448] ss:$16 sps:$4 sm:$0xff]  }
  0x69   :  { %1285 = vmatpush1.bf16.msra.mxu0 %v3263_v29  ;;  %1414 = vmatpush1.bf16.msra.mxu1 %v3266_v30  ;;  %v3349_v29 = vld [vmem:[#allocation3 + $0x464] ss:$16 sps:$4 sm:$0xff]   ;;  %v3352_v30 = vld [vmem:[#allocation3 + $0x46c] ss:$16 sps:$4 sm:$0xff]  }
  0x6a   :  { %1286 = vmatprep.subr.bf16.mxu0 %v3271_v31  ;;  %1415 = vmatprep.subr.bf16.mxu1 %v3274_v32  ;;  %v3347_v31 = vld [vmem:[#allocation3 + $0x460] ss:$16 sps:$4 sm:$0xff]   ;;  %v3350_v32 = vld [vmem:[#allocation3 + $0x468] ss:$16 sps:$4 sm:$0xff]  }
  0x6d   :  { %1287 = vmatpush1.bf16.msra.mxu0 %v3269_v35  ;;  %1416 = vmatpush1.bf16.msra.mxu1 %v3272_v36  ;;  %v3353_v35 = vld [vmem:[#allocation3 + $0x480] ss:$16 sps:$4 sm:$0xff]   ;;  %v3356_v36 = vld [vmem:[#allocation3 + $0x488] ss:$16 sps:$4 sm:$0xff]  }
  0x6e   :  { %1288 = vmatprep.subr.bf16.mxu0 %v3277_v38  ;;  %1417 = vmatprep.subr.bf16.mxu1 %v3280_v39  ;;  %v3364_v38 = vld [vmem:[#allocation3 + $0x4ac] ss:$16 sps:$4 sm:$0xff]   ;;  %v3359_v39 = vld [vmem:[#allocation3 + $0x4a0] ss:$16 sps:$4 sm:$0xff]  }
  0x71   :  { %1289 = vmatpush1.bf16.msra.mxu0 %v3275_v40  ;;  %1418 = vmatpush1.bf16.msra.mxu1 %v3278_v41  ;;  %v3362_v40 = vld [vmem:[#allocation3 + $0x4a8] ss:$16 sps:$4 sm:$0xff]   ;;  %v3367_v41 = vld [vmem:[#allocation3 + $0x4c4] ss:$16 sps:$4 sm:$0xff]  }
  0x72   :  { %1290 = vmatprep.subr.bf16.mxu0 %v3283_v42  ;;  %1419 = vmatprep.subr.bf16.mxu1 %v3286_v43  ;;  %v3370_v42 = vld [vmem:[#allocation3 + $0x4cc] ss:$16 sps:$4 sm:$0xff]   ;;  %v3365_v43 = vld [vmem:[#allocation3 + $0x4c0] ss:$16 sps:$4 sm:$0xff]  }
  0x75   :  { %1291 = vmatpush1.bf16.msra.mxu0 %v3281_v44  ;;  %1420 = vmatpush1.bf16.msra.mxu1 %v3284_v45  ;;  %v3368_v44 = vld [vmem:[#allocation3 + $0x4c8] ss:$16 sps:$4 sm:$0xff]   ;;  %v3373_v45 = vld [vmem:[#allocation3 + $0x4e4] ss:$16 sps:$4 sm:$0xff]  }
  0x76   :  { %1292 = vmatprep.subr.bf16.mxu0 %v3289_v46  ;;  %1421 = vmatprep.subr.bf16.mxu1 %v3292_v47  ;;  %v3376_v46 = vld [vmem:[#allocation3 + $0x4ec] ss:$16 sps:$4 sm:$0xff]   ;;  %v3371_v47 = vld [vmem:[#allocation3 + $0x4e0] ss:$16 sps:$4 sm:$0xff]  }
  0x79   :  { %1293 = vmatpush1.bf16.msra.mxu0 %v3287_v48  ;;  %1422 = vmatpush1.bf16.msra.mxu1 %v3290_v49  ;;  %v3374_v48 = vld [vmem:[#allocation3 + $0x4e8] ss:$16 sps:$4 sm:$0xff]   ;;  %v3379_v49 = vld [vmem:[#allocation3 + $0x504] ss:$16 sps:$4 sm:$0xff]  }
  0x7a   :  { %1294 = vmatprep.subr.bf16.mxu0 %v3295_v50  ;;  %1423 = vmatprep.subr.bf16.mxu1 %v3298_v51  ;;  %v3382_v50 = vld [vmem:[#allocation3 + $0x50c] ss:$16 sps:$4 sm:$0xff]   ;;  %v3377_v51 = vld [vmem:[#allocation3 + $0x500] ss:$16 sps:$4 sm:$0xff]  }
  0x7d   :  { %1295 = vmatpush1.bf16.msra.mxu0 %v3293_v52  ;;  %1424 = vmatpush1.bf16.msra.mxu1 %v3296_v53  ;;  %v3380_v52 = vld [vmem:[#allocation3 + $0x508] ss:$16 sps:$4 sm:$0xff]   ;;  %v3385_v53 = vld [vmem:[#allocation3 + $0x524] ss:$16 sps:$4 sm:$0xff]  }
  0x7e   :  { %1296 = vmatprep.subr.bf16.mxu0 %v3301_v54  ;;  %1425 = vmatprep.subr.bf16.mxu1 %v3304_v55  ;;  %v3388_v54 = vld [vmem:[#allocation3 + $0x52c] ss:$16 sps:$4 sm:$0xff]   ;;  %v3383_v55 = vld [vmem:[#allocation3 + $0x520] ss:$16 sps:$4 sm:$0xff]  }
  0x81   :  { %1297 = vmatpush1.bf16.msra.mxu0 %v3299_v56  ;;  %1426 = vmatpush1.bf16.msra.mxu1 %v3302_v57  ;;  %v3386_v56 = vld [vmem:[#allocation3 + $0x528] ss:$16 sps:$4 sm:$0xff]   ;;  %v3391_v57 = vld [vmem:[#allocation3 + $0x544] ss:$16 sps:$4 sm:$0xff]  }
  0x82   :  { %1298 = vmatprep.subr.bf16.mxu0 %v3307_v58  ;;  %1427 = vmatprep.subr.bf16.mxu1 %v3310_v59  ;;  %v3394_v58 = vld [vmem:[#allocation3 + $0x54c] ss:$16 sps:$4 sm:$0xff]   ;;  %v3389_v59 = vld [vmem:[#allocation3 + $0x540] ss:$16 sps:$4 sm:$0xff]  }
  0x85   :  { %1299 = vmatpush1.bf16.msra.mxu0 %v3305_v60  ;;  %1428 = vmatpush1.bf16.msra.mxu1 %v3308_v61  ;;  %v3392_v60 = vld [vmem:[#allocation3 + $0x548] ss:$16 sps:$4 sm:$0xff]   ;;  %v3397_v61 = vld [vmem:[#allocation3 + $0x564] ss:$16 sps:$4 sm:$0xff]  }
  0x86   :  { %1300 = vmatprep.subr.bf16.mxu0 %v3313_v62  ;;  %1429 = vmatprep.subr.bf16.mxu1 %v3316_v63  ;;  %v3400_v62 = vld [vmem:[#allocation3 + $0x56c] ss:$16 sps:$4 sm:$0xff]   ;;  %v3395_v63 = vld [vmem:[#allocation3 + $0x560] ss:$16 sps:$4 sm:$0xff]  }
  0x89   :  { %1301 = vmatpush1.bf16.msra.mxu0 %v3311_v0  ;;  %1430 = vmatpush1.bf16.msra.mxu1 %v3314_v1  ;;  %v3398_v0 = vld [vmem:[#allocation3 + $0x568] ss:$16 sps:$4 sm:$0xff]   ;;  %v3403_v1 = vld [vmem:[#allocation3 + $0x584] ss:$16 sps:$4 sm:$0xff]  }
  0x8a   :  { %1302 = vmatprep.subr.bf16.mxu0 %v3319_v2  ;;  %1431 = vmatprep.subr.bf16.mxu1 %v3322_v3  ;;  %v3406_v2 = vld [vmem:[#allocation3 + $0x58c] ss:$16 sps:$4 sm:$0xff]   ;;  %v3401_v3 = vld [vmem:[#allocation3 + $0x580] ss:$16 sps:$4 sm:$0xff]  }
  0x8d   :  { %1303 = vmatpush1.bf16.msra.mxu0 %v3317_v4  ;;  %1432 = vmatpush1.bf16.msra.mxu1 %v3320_v5  ;;  %v3404_v4 = vld [vmem:[#allocation3 + $0x588] ss:$16 sps:$4 sm:$0xff]   ;;  %v3409_v5 = vld [vmem:[#allocation3 + $0x5a4] ss:$16 sps:$4 sm:$0xff]  }
  0x8e   :  { %1304 = vmatprep.subr.bf16.mxu0 %v3325_v6  ;;  %1433 = vmatprep.subr.bf16.mxu1 %v3328_v7  ;;  %v3412_v6 = vld [vmem:[#allocation3 + $0x5ac] ss:$16 sps:$4 sm:$0xff]   ;;  %v3407_v7 = vld [vmem:[#allocation3 + $0x5a0] ss:$16 sps:$4 sm:$0xff]  }
  0x91   :  { %1305 = vmatpush1.bf16.msra.mxu0 %v3323_v8  ;;  %1434 = vmatpush1.bf16.msra.mxu1 %v3326_v9  ;;  %v3410_v8 = vld [vmem:[#allocation3 + $0x5a8] ss:$16 sps:$4 sm:$0xff]   ;;  %v3415_v9 = vld [vmem:[#allocation3 + $0x5c4] ss:$16 sps:$4 sm:$0xff]  }
  0x92   :  { %1317 = vmatprep.subr.bf16.mxu0 %v3331_v10  ;;  %1446 = vmatprep.subr.bf16.mxu1 %v3334_v13  ;;  %v3418_v10 = vld [vmem:[#allocation3 + $0x5cc] ss:$16 sps:$4 sm:$0xff]   ;;  %v3421_v13 = vld [vmem:[#allocation3 + $0x5e4] ss:$16 sps:$4 sm:$0xff]  }
  0x94   :  { %1307 = vmatmul.mubr.bf16.vlgmr.msra.gmra.mrb[0].mxu0 %v75_v17  ;;  %1436 = vmatmul.mubr.bf16.vlgmr.msra.gmra.mrb[0].mxu1 %v75_v17  ;;  %v3422_v17 = vld [vmem:[#allocation3 + $0x5e8] ss:$16 sps:$4 sm:$0xff]  }
  0x95   :  { %1318 = vmatpush1.bf16.msra.mxu0 %v3329_v14  ;;  %1447 = vmatpush1.bf16.msra.mxu1 %v3332_v16  ;;  %v3424_v14 = vld [vmem:[#allocation3 + $0x5ec] ss:$16 sps:$4 sm:$0xff]   ;;  %v3419_v16 = vld [vmem:[#allocation3 + $0x5e0] ss:$16 sps:$4 sm:$0xff]  }
  0x96   :  { %1319 = vmatprep.subr.bf16.mxu0 %v3337_v18  ;;  %1448 = vmatprep.subr.bf16.mxu1 %v3340_v19  ;;  %v65_v18 = vld [vmem:[%s4411_s0 + $0x20] sm:$0xff]  ;;  %v71_v19 = vld [vmem:[%s4411_s0 + $0x50] sm:$0xf] }
  0x97   :  { %1349 = vmatprep.mubr.bf16.mxu0 %v78_v24  ;;  %1478 = vmatprep.mubr.bf16.mxu1 %v78_v24  ;;  %v77_v20 = vpack.c.bf16 %v71_v19, %v65_v18  ;;  %v59_v24 = vld [vmem:[#allocation2 + $0x30] sm:$0xf] }
  0x99   :  { %1320 = vmatpush1.bf16.msra.mxu0 %v3335_v22  ;;  %1449 = vmatpush1.bf16.msra.mxu1 %v3338_v23  ;;  %v57_v23 = vld [vmem:[#allocation2 + $0x20] sm:$0xf] }
  0x9a   :  { %1321 = vmatprep.subr.bf16.mxu0 %v3343_v25  ;;  %1450 = vmatprep.subr.bf16.mxu1 %v3346_v26 }
  0x9d   :  { %1322 = vmatpush1.bf16.msra.mxu0 %v3341_v27  ;;  %1451 = vmatpush1.bf16.msra.mxu1 %v3344_v28  ;;  %v58_v27 = vld [vmem:[#allocation2 + $0x28] sm:$0xf]  ;;  %v60_v28 = vld [vmem:[#allocation2 + $0x38] sm:$0xf] }
  0x9e   :  { %1323 = vmatprep.subr.bf16.mxu0 %v3349_v29  ;;  %1452 = vmatprep.subr.bf16.mxu1 %v3352_v30 }
  0xa1   :  { %1324 = vmatpush1.bf16.msra.mxu0 %v3347_v31  ;;  %1453 = vmatpush1.bf16.msra.mxu1 %v3350_v32 }
  0xa2   :  { %1325 = vmatprep.subr.bf16.mxu0 %v3355_v33  ;;  %1454 = vmatprep.subr.bf16.mxu1 %v3358_v34 }
  0xa5   :  { %1326 = vmatpush1.bf16.msra.mxu0 %v3353_v35  ;;  %1455 = vmatpush1.bf16.msra.mxu1 %v3356_v36 }
  0xa6   :  { %1327 = vmatprep.subr.bf16.mxu0 %v3361_v37  ;;  %1456 = vmatprep.subr.bf16.mxu1 %v3364_v38 }
  0xa9   :  { %1328 = vmatpush1.bf16.msra.mxu0 %v3359_v39  ;;  %1457 = vmatpush1.bf16.msra.mxu1 %v3362_v40 }
  0xaa   :  { %1329 = vmatprep.subr.bf16.mxu0 %v3367_v41  ;;  %1458 = vmatprep.subr.bf16.mxu1 %v3370_v42 }
  0xad   :  { %1330 = vmatpush1.bf16.msra.mxu0 %v3365_v43  ;;  %1459 = vmatpush1.bf16.msra.mxu1 %v3368_v44 }
  0xae   :  { %1331 = vmatprep.subr.bf16.mxu0 %v3373_v45  ;;  %1460 = vmatprep.subr.bf16.mxu1 %v3376_v46 }
  0xb1   :  { %1332 = vmatpush1.bf16.msra.mxu0 %v3371_v47  ;;  %1461 = vmatpush1.bf16.msra.mxu1 %v3374_v48  ;;  %v4437_v47 = vmov 0 }
  0xb2   :  { %1333 = vmatprep.subr.bf16.mxu0 %v3379_v49  ;;  %1462 = vmatprep.subr.bf16.mxu1 %v3382_v50  ;;  %v4438_v47 = vsel %vm3695_vm2, 4294967295, %v4437_v47 }
  0xb3   :  { %4439 = vst [vmem:[#allocation12_spill] sm:$0xff] %v4438_v47 }
  0xb5   :  { %1334 = vmatpush1.bf16.msra.mxu0 %v3377_v51  ;;  %1463 = vmatpush1.bf16.msra.mxu1 %v3380_v52 }
  0xb6   :  { %1335 = vmatprep.subr.bf16.mxu0 %v3385_v53  ;;  %1464 = vmatprep.subr.bf16.mxu1 %v3388_v54  ;;  %v1524_v54 = vld [vmem:[%s4413_s2] sm:$0xff] }
  0xb9   :  { %1336 = vmatpush1.bf16.msra.mxu0 %v3383_v55  ;;  %1465 = vmatpush1.bf16.msra.mxu1 %v3386_v56  ;;  %v1525_v55 = vld [vmem:[%s4413_s2 + $0x8] sm:$0xff]  ;;  %v1526_v56 = vld [vmem:[%s4413_s2 + $0x10] sm:$0xff] }
  0xba   :  { %1337 = vmatprep.subr.bf16.mxu0 %v3391_v57  ;;  %1466 = vmatprep.subr.bf16.mxu1 %v3394_v58  ;;  %v1527_v57 = vld [vmem:[%s4413_s2 + $0x18] sm:$0xff]  ;;  %v1528_v58 = vld [vmem:[%s4413_s2 + $0x20] sm:$0xff] }
  0xbd   :  { %1338 = vmatpush1.bf16.msra.mxu0 %v3389_v59  ;;  %1467 = vmatpush1.bf16.msra.mxu1 %v3392_v60  ;;  %v1529_v59 = vld [vmem:[%s4413_s2 + $0x28] sm:$0xff]  ;;  %v1530_v60 = vld [vmem:[%s4413_s2 + $0x30] sm:$0xff] }
  0xbe   :  { %1339 = vmatprep.subr.bf16.mxu0 %v3397_v61  ;;  %1468 = vmatprep.subr.bf16.mxu1 %v3400_v62  ;;  %v1531_v61 = vld [vmem:[%s4413_s2 + $0x38] sm:$0xff] }
  0xc1   :  { %1340 = vmatpush1.bf16.msra.mxu0 %v3395_v63  ;;  %1469 = vmatpush1.bf16.msra.mxu1 %v3398_v0 }
  0xc2   :  { %1341 = vmatprep.subr.bf16.mxu0 %v3403_v1  ;;  %1470 = vmatprep.subr.bf16.mxu1 %v3406_v2 }
  0xc5   :  { %1342 = vmatpush1.bf16.msra.mxu0 %v3401_v3  ;;  %1471 = vmatpush1.bf16.msra.mxu1 %v3404_v4 }
  0xc6   :  { %1343 = vmatprep.subr.bf16.mxu0 %v3409_v5  ;;  %1472 = vmatprep.subr.bf16.mxu1 %v3412_v6 }
  0xc9   :  { %1344 = vmatpush1.bf16.msra.mxu0 %v3407_v7  ;;  %1473 = vmatpush1.bf16.msra.mxu1 %v3410_v8 }
  0xca   :  { %1345 = vmatprep.subr.bf16.mxu0 %v3415_v9  ;;  %1474 = vmatprep.subr.bf16.mxu1 %v3418_v10 }
  0xcd   :  { %1346 = vmatpush1.bf16.msra.mxu0 %v3413_v11  ;;  %1475 = vmatpush1.bf16.msra.mxu1 %v3416_v12 }
  0xce   :  { %1347 = vmatprep.subr.bf16.mxu0 %v3421_v13  ;;  %1476 = vmatprep.subr.bf16.mxu1 %v3424_v14 }
  0xd1   :  { %1348 = vmatpush1.bf16.msra.mxu0 %v3419_v16  ;;  %1477 = vmatpush1.bf16.msra.mxu1 %v3422_v17 }
  0xd4   :  { %1350 = vmatmul.mubr.bf16.vlgmr.msra.gmra.mrb[0].mxu0 %v77_v20  ;;  %1479 = vmatmul.mubr.bf16.vlgmr.msra.gmra.mrb[0].mxu1 %v77_v20 }
  0xd5   :  { %1634 = vmatprep.mubr.f32.mxu0 %v4427_v15  ;;  %1747 = vmatprep.mubr.f32.mxu1 %v4427_v15 }
 0x1a7   :  { %v3673_v21 = vpop.f32.mrb[0].mxu0  ;;  %v3675_v22 = vpop.f32.mrb[0].mxu1 }
 0x1a8   :  { %v3677_v25 = vpop.f32.mrb[1].mxu0  ;;  %v3679_v26 = vpop.f32.mrb[1].mxu1  ;;  %v4426_v48 = vmax.f32 %v3673_v21, 0.0  ;;  %v4425_v49 = vmax.f32 %v3675_v22, 0.0 }
 0x1a9   :  { %v1355_v29 = vpop.f32.mrb[2].mxu0  ;;  %v1484_v30 = vpop.f32.mrb[2].mxu1  ;;  %v4424_v43 = vmax.f32 %v3677_v25, 0.0  ;;  %v4423_v45 = vmax.f32 %v3679_v26, 0.0 }
 0x1aa   :  { %v1493_v31 = vadd.f32 %v1355_v29, %v57_v23  ;;  %v1495_v32 = vadd.f32 %v1484_v30, %v59_v24  ;;  %v1357_v33 = vpop.f32.mrb[3].mxu0  ;;  %v1486_v34 = vpop.f32.mrb[3].mxu1 }
 0x1ab   :  { %v1494_v35 = vadd.f32 %v1357_v33, %v58_v27  ;;  %v1496_v36 = vadd.f32 %v1486_v34, %v60_v28 }
 0x1ac   :  { %1501 = vst [vmem:[#allocation2 + $0x20] sm:$0xf] %v1493_v31  ;;  %1503 = vst [vmem:[#allocation2 + $0x30] sm:$0xf] %v1495_v32 }
 0x1ad   :  { %1502 = vst [vmem:[#allocation2 + $0x28] sm:$0xf] %v1494_v35  ;;  %1504 = vst [vmem:[#allocation2 + $0x38] sm:$0xf] %v1496_v36 }
 0x1b3   :  { %v3681_v37 = vld [vmem:[#allocation2 + $0x20] sm:$0xf]  ;;  %v3683_v38 = vld [vmem:[#allocation2 + $0x30] sm:$0xf] }
 0x1b4   :  { %4434 = vst [vmem:[#allocation9_spill] sm:$0xff] %v3683_v38  ;;  %v3685_v39 = vld [vmem:[#allocation2 + $0x28] sm:$0xf]  ;;  %v3687_v40 = vld [vmem:[#allocation2 + $0x38] sm:$0xf]  ;;  %v4422_v41 = vmax.f32 %v3681_v37, 0.0 }
 0x1b5   :  { %4435 = vst [vmem:[#allocation10_spill] sm:$0xff] %v3685_v39  ;;  %4436 = vst [vmem:[#allocation11_spill] sm:$0xff] %v3687_v40  ;;  %v4421_v42 = vmax.f32 %v3683_v38, 0.0  ;;  %v4420_v44 = vmax.f32 %v3685_v39, 0.0  ;;  %v4419_v46 = vmax.f32 %v3687_v40, 0.0 }
 0x1b6   :  { %v2998_v52 = vpack.c.bf16 %v4422_v41, %v4426_v48 }
 0x1b7   :  { %v2995_v50 = vpack.c.bf16 %v4420_v44, %v4424_v43  ;;  %v3001_v51 = vpack.c.bf16 %v4419_v46, %v4423_v45  ;;  %v3004_v53 = vpack.c.bf16 %v4421_v42, %v4425_v49 }
 0x1b9   :  { %2997 = vmatprep.subr.msk.bf16.mxu0 %vm3695_vm2, %v2995_v50  ;;  %3003 = vmatprep.subr.msk.bf16.mxu1 %vm3695_vm2, %v3001_v51 }
 0x1ba   :  { %3000 = vmatpush1.bf16.msk.msra.mxu0 %vm3695_vm2, %v2998_v52  ;;  %3006 = vmatpush1.bf16.msk.msra.mxu1 %vm3695_vm2, %v3004_v53 }
 0x1bd   :  { %2896 = vmatmul.mubr.msk.f32.vlgmr.msra.gmra.mrb[4].mxu0 %vm1532_vm3, %v1524_v54  ;;  %2906 = vmatmul.mubr.msk.f32.vlgmr.msra.gmra.mrb[4].mxu1 %vm1532_vm3, %v1524_v54 }
 0x1be   :  { %1640 = vmatprep.mubr.f32.mxu0 %v4427_v15  ;;  %1753 = vmatprep.mubr.f32.mxu1 %v4427_v15 }
 0x1c1   :  { %2897 = vmatmul.mubr.msk.f32.gmra.mrb[6].mxu0 %vm1532_vm3, %v1525_v55  ;;  %2907 = vmatmul.mubr.msk.f32.gmra.mrb[6].mxu1 %vm1532_vm3, %v1525_v55 }
 0x1c2   :  { %1646 = vmatprep.mubr.f32.mxu0 %v4427_v15  ;;  %1759 = vmatprep.mubr.f32.mxu1 %v4427_v15 }
 0x1c5   :  { %2898 = vmatmul.mubr.msk.f32.gmra.mrb[8].mxu0 %vm1532_vm3, %v1526_v56  ;;  %2908 = vmatmul.mubr.msk.f32.gmra.mrb[8].mxu1 %vm1532_vm3, %v1526_v56 }
 0x1c6   :  { %1652 = vmatprep.mubr.f32.mxu0 %v4427_v15  ;;  %1765 = vmatprep.mubr.f32.mxu1 %v4427_v15 }
 0x1c9   :  { %2899 = vmatmul.mubr.msk.f32.gmra.mrb[10].mxu0 %vm1532_vm3, %v1527_v57  ;;  %2909 = vmatmul.mubr.msk.f32.gmra.mrb[10].mxu1 %vm1532_vm3, %v1527_v57 }
 0x1ca   :  { %1658 = vmatprep.mubr.f32.mxu0 %v4427_v15  ;;  %1771 = vmatprep.mubr.f32.mxu1 %v4427_v15 }
 0x1cd   :  { %2900 = vmatmul.mubr.msk.f32.gmra.mrb[12].mxu0 %vm1532_vm3, %v1528_v58  ;;  %2910 = vmatmul.mubr.msk.f32.gmra.mrb[12].mxu1 %vm1532_vm3, %v1528_v58 }
 0x1ce   :  { %1664 = vmatprep.mubr.f32.mxu0 %v4427_v15  ;;  %1777 = vmatprep.mubr.f32.mxu1 %v4427_v15 }
 0x1d1   :  { %2901 = vmatmul.mubr.msk.f32.gmra.mrb[14].mxu0 %vm1532_vm3, %v1529_v59  ;;  %2911 = vmatmul.mubr.msk.f32.gmra.mrb[14].mxu1 %vm1532_vm3, %v1529_v59 }
 0x1d2   :  { %1670 = vmatprep.mubr.f32.mxu0 %v4427_v15  ;;  %1783 = vmatprep.mubr.f32.mxu1 %v4427_v15 }
 0x1d5   :  { %2902 = vmatmul.mubr.msk.f32.gmra.mrb[16].mxu0 %vm1532_vm3, %v1530_v60  ;;  %2912 = vmatmul.mubr.msk.f32.gmra.mrb[16].mxu1 %vm1532_vm3, %v1530_v60 }
 0x1d6   :  { %1676 = vmatprep.mubr.f32.mxu0 %v4427_v15  ;;  %1789 = vmatprep.mubr.f32.mxu1 %v4427_v15 }
 0x1d9   :  { %2903 = vmatmul.mubr.msk.f32.gmra.mrb[18].mxu0 %vm1532_vm3, %v1531_v61  ;;  %2913 = vmatmul.mubr.msk.f32.gmra.mrb[18].mxu1 %vm1532_vm3, %v1531_v61 }
 0x1da   :  { %2205 = vmatprep.mubr.f32.mxu0 %v4427_v15  ;;  %2282 = vmatprep.mubr.f32.mxu1 %v4427_v15 }
 0x290   :  { %v3781_v62 = vpop.f32.mrb[4].mxu0  ;;  %v3783_v63 = vpop.f32.mrb[4].mxu1 }
 0x291   :  { %v3785_v0 = vpop.f32.mrb[5].mxu0  ;;  %v3787_v1 = vpop.f32.mrb[5].mxu1 }
 0x292   :  { %v1796_v2 = vmax.f32 %v3781_v62, %v3785_v0 }
 0x294   :  { %v1797_v3 = vmax.f32 %v1796_v2, %v3783_v63  ;;  %v3792_v4 = vpop.f32.mrb[6].mxu0  ;;  %v3794_v5 = vpop.f32.mrb[6].mxu1 }
 0x295   :  { %v3796_v6 = vpop.f32.mrb[7].mxu0  ;;  %v3798_v7 = vpop.f32.mrb[7].mxu1 }
 0x296   :  { %v1801_v8 = vmax.f32 %v3792_v4, %v3796_v6  ;;  %v1798_v9 = vmax.f32 %v1797_v3, %v3787_v1 }
 0x298   :  { %v1802_v10 = vmax.f32 %v1801_v8, %v3794_v5  ;;  %1799 = vmax.xlane.f32.xlu0 %v1798_v9  ;;  %v3804_v11 = vpop.f32.mrb[8].mxu0  ;;  %v3806_v12 = vpop.f32.mrb[8].mxu1 }
 0x299   :  { %v3808_v13 = vpop.f32.mrb[9].mxu0  ;;  %v3810_v14 = vpop.f32.mrb[9].mxu1 }
 0x29a   :  { %v1806_v16 = vmax.f32 %v3804_v11, %v3808_v13  ;;  %v1803_v17 = vmax.f32 %v1802_v10, %v3798_v7 }
 0x29c   :  { %v1807_v18 = vmax.f32 %v1806_v16, %v3806_v12  ;;  %1804 = vmax.xlane.f32.xlu0 %v1803_v17  ;;  %v3816_v19 = vpop.f32.mrb[10].mxu0  ;;  %v3818_v20 = vpop.f32.mrb[10].mxu1 }
 0x29d   :  { %v3820_v23 = vpop.f32.mrb[11].mxu0  ;;  %v3822_v24 = vpop.f32.mrb[11].mxu1 }
 0x29e   :  { %v1811_v27 = vmax.f32 %v3816_v19, %v3820_v23  ;;  %v1808_v28 = vmax.f32 %v1807_v18, %v3810_v14 }
 0x2a0   :  { %v1812_v29 = vmax.f32 %v1811_v27, %v3818_v20  ;;  %1809 = vmax.xlane.f32.xlu1 %v1808_v28  ;;  %v3828_v30 = vpop.f32.mrb[12].mxu0  ;;  %v3830_v31 = vpop.f32.mrb[12].mxu1 }
 0x2a1   :  { %v3832_v32 = vpop.f32.mrb[13].mxu0  ;;  %v3834_v33 = vpop.f32.mrb[13].mxu1 }
 0x2a2   :  { %v1816_v34 = vmax.f32 %v3828_v30, %v3832_v32  ;;  %v1813_v35 = vmax.f32 %v1812_v29, %v3822_v24 }
 0x2a4   :  { %v1817_v36 = vmax.f32 %v1816_v34, %v3830_v31  ;;  %1814 = vmax.xlane.f32.xlu1 %v1813_v35  ;;  %v3840_v50 = vpop.f32.mrb[14].mxu0  ;;  %v3842_v51 = vpop.f32.mrb[14].mxu1 }
 0x2a5   :  { %v3844_v52 = vpop.f32.mrb[15].mxu0  ;;  %v3846_v53 = vpop.f32.mrb[15].mxu1 }
 0x2a6   :  { %v1821_v54 = vmax.f32 %v3840_v50, %v3844_v52  ;;  %v1818_v55 = vmax.f32 %v1817_v36, %v3834_v33 }
 0x2a8   :  { %v1822_v56 = vmax.f32 %v1821_v54, %v3842_v51  ;;  %1819 = vmax.xlane.f32.xlu0 %v1818_v55  ;;  %v3852_v57 = vpop.f32.mrb[16].mxu0  ;;  %v3854_v58 = vpop.f32.mrb[16].mxu1 }
 0x2a9   :  { %v3856_v59 = vpop.f32.mrb[17].mxu0  ;;  %v3858_v60 = vpop.f32.mrb[17].mxu1 }
 0x2aa   :  { %v1826_v61 = vmax.f32 %v3852_v57, %v3856_v59  ;;  %v1823_v2 = vmax.f32 %v1822_v56, %v3846_v53 }
 0x2ac   :  { %v1827_v3 = vmax.f32 %v1826_v61, %v3854_v58  ;;  %1824 = vmax.xlane.f32.xlu1 %v1823_v2  ;;  %v3864_v8 = vpop.f32.mrb[18].mxu0  ;;  %v3866_v9 = vpop.f32.mrb[18].mxu1 }
 0x2ad   :  { %v3868_v10 = vpop.f32.mrb[19].mxu0  ;;  %v3870_v16 = vpop.f32.mrb[19].mxu1 }
 0x2ae   :  { %v1831_v17 = vmax.f32 %v3864_v8, %v3868_v10  ;;  %v1828_v18 = vmax.f32 %v1827_v3, %v3858_v60 }
 0x2b0   :  { %v1832_v27 = vmax.f32 %v1831_v17, %v3866_v9  ;;  %1829 = vmax.xlane.f32.xlu0 %v1828_v18 }
 0x2b2   :  { %v1833_v28 = vmax.f32 %v1832_v27, %v3870_v16 }
 0x2b4   :  { %1834 = vmax.xlane.f32.xlu1 %v1833_v28 }
 0x325   :  { %v1800_v29 = vpop.xlane.xlu0 %1799 }
 0x326   :  { %v1836_v34 = vsub.f32 %v3781_v62, %v1800_v29  ;;  %v1837_v35 = vsub.f32 %v3785_v0, %v1800_v29  ;;  %v1838_v36 = vsub.f32 %v3783_v63, %v1800_v29  ;;  %v1839_v54 = vsub.f32 %v3787_v1, %v1800_v29 }
 0x328   :  { %v1868_v55 = vmul.f32 1.442695, %v1836_v34  ;;  %v1870_v56 = vmul.f32 1.442695, %v1837_v35  ;;  %v1872_v61 = vmul.f32 1.442695, %v1838_v36 }
 0x329   :  { %v1874_v2 = vmul.f32 1.442695, %v1839_v54  ;;  %v1805_v3 = vpop.xlane.xlu0 %1804 }
 0x32a   :  { %3425 = vpow2.f32 %v1868_v55  ;;  %v1840_v17 = vsub.f32 %v3792_v4, %v1805_v3  ;;  %v1841_v18 = vsub.f32 %v3796_v6, %v1805_v3  ;;  %v1842_v27 = vsub.f32 %v3794_v5, %v1805_v3 }
 0x32b   :  { %3427 = vpow2.f32 %v1870_v56  ;;  %v1843_v62 = vsub.f32 %v3798_v7, %v1805_v3 }
 0x32c   :  { %3429 = vpow2.f32 %v1872_v61  ;;  %v1876_v0 = vmul.f32 1.442695, %v1840_v17  ;;  %v1878_v63 = vmul.f32 1.442695, %v1841_v18  ;;  %v1880_v28 = vmul.f32 1.442695, %v1842_v27 }
 0x32d   :  { %3431 = vpow2.f32 %v1874_v2  ;;  %v1882_v1 = vmul.f32 1.442695, %v1843_v62  ;;  %v1810_v29 = vpop.xlane.xlu1 %1809 }
 0x32e   :  { %3433 = vpow2.f32 %v1876_v0  ;;  %v1844_v34 = vsub.f32 %v3804_v11, %v1810_v29  ;;  %v1845_v35 = vsub.f32 %v3808_v13, %v1810_v29  ;;  %v1846_v4 = vsub.f32 %v3806_v12, %v1810_v29 }
 0x32f   :  { %3435 = vpow2.f32 %v1878_v63  ;;  %v1847_v5 = vsub.f32 %v3810_v14, %v1810_v29 }
 0x330   :  { %3437 = vpow2.f32 %v1880_v28  ;;  %v1884_v6 = vmul.f32 1.442695, %v1844_v34  ;;  %v1886_v7 = vmul.f32 1.442695, %v1845_v35  ;;  %v1888_v36 = vmul.f32 1.442695, %v1846_v4 }
 0x331   :  { %3439 = vpow2.f32 %v1882_v1  ;;  %v1890_v54 = vmul.f32 1.442695, %v1847_v5  ;;  %v1815_v55 = vpop.xlane.xlu1 %1814 }
 0x332   :  { %3441 = vpow2.f32 %v1884_v6  ;;  %v1848_v56 = vsub.f32 %v3816_v19, %v1815_v55  ;;  %v1849_v61 = vsub.f32 %v3820_v23, %v1815_v55  ;;  %v1850_v11 = vsub.f32 %v3818_v20, %v1815_v55 }
 0x333   :  { %3443 = vpow2.f32 %v1886_v7  ;;  %v1851_v12 = vsub.f32 %v3822_v24, %v1815_v55 }
 0x334   :  { %v3893_v13 = vpop.eup %3425  ;;  %3445 = vpow2.f32 %v1888_v36  ;;  %v1892_v14 = vmul.f32 1.442695, %v1848_v56  ;;  %v1894_v2 = vmul.f32 1.442695, %v1849_v61  ;;  %v1896_v3 = vmul.f32 1.442695, %v1850_v11 }
 0x335   :  { %v3895_v17 = vpop.eup %3427  ;;  %3447 = vpow2.f32 %v1890_v54  ;;  %v1898_v18 = vmul.f32 1.442695, %v1851_v12  ;;  %v1820_v27 = vpop.xlane.xlu0 %1819 }
 0x336   :  { %v3897_v62 = vpop.eup %3429  ;;  %3449 = vpow2.f32 %v1892_v14  ;;  %v1852_v19 = vsub.f32 %v3828_v30, %v1820_v27  ;;  %v1853_v20 = vsub.f32 %v3832_v32, %v1820_v27  ;;  %v1854_v23 = vsub.f32 %v3830_v31, %v1820_v27 }
 0x337   :  { %v3902_v24 = vpop.eup %3431  ;;  %3451 = vpow2.f32 %v1894_v2  ;;  %v1855_v0 = vsub.f32 %v3834_v33, %v1820_v27  ;;  %v1932_v63 = vadd.f32 %v3895_v17, %v3893_v13 }
 0x338   :  { %v3907_v28 = vpop.eup %3433  ;;  %3453 = vpow2.f32 %v1896_v3  ;;  %v1900_v1 = vmul.f32 1.442695, %v1852_v19  ;;  %v1902_v29 = vmul.f32 1.442695, %v1853_v20  ;;  %v1904_v34 = vmul.f32 1.442695, %v1854_v23 }
 0x339   :  { %v3909_v35 = vpop.eup %3435  ;;  %3455 = vpow2.f32 %v1898_v18  ;;  %v1906_v30 = vmul.f32 1.442695, %v1855_v0  ;;  %v1825_v32 = vpop.xlane.xlu1 %1824  ;;  %v1933_v31 = vadd.f32 %v3897_v62, %v1932_v63 }
 0x33a   :  { %v3912_v4 = vpop.eup %3437  ;;  %3457 = vpow2.f32 %v1900_v1  ;;  %v1856_v33 = vsub.f32 %v3840_v50, %v1825_v32  ;;  %v1857_v5 = vsub.f32 %v3844_v52, %v1825_v32  ;;  %v1858_v6 = vsub.f32 %v3842_v51, %v1825_v32 }
 0x33b   :  { %v3917_v7 = vpop.eup %3439  ;;  %3459 = vpow2.f32 %v1902_v29  ;;  %v1859_v36 = vsub.f32 %v3846_v53, %v1825_v32  ;;  %v1934_v54 = vadd.f32 %v3902_v24, %v1933_v31  ;;  %v1937_v55 = vadd.f32 %v3909_v35, %v3907_v28 }
 0x33c   :  { %v3923_v56 = vpop.eup %3441  ;;  %3461 = vpow2.f32 %v1904_v34  ;;  %v1908_v61 = vmul.f32 1.442695, %v1856_v33  ;;  %v1910_v11 = vmul.f32 1.442695, %v1857_v5  ;;  %v1912_v50 = vmul.f32 1.442695, %v1858_v6 }
 0x33d   :  { %v3925_v12 = vpop.eup %3443  ;;  %3463 = vpow2.f32 %v1906_v30  ;;  %v1914_v51 = vmul.f32 1.442695, %v1859_v36  ;;  %1935 = vadd.xlane.f32.xlu0 %v1934_v54  ;;  %v1830_v52 = vpop.xlane.xlu0 %1829  ;;  %v1938_v14 = vadd.f32 %v3912_v4, %v1937_v55 }
 0x33e   :  { %v3928_v53 = vpop.eup %3445  ;;  %3465 = vpow2.f32 %v1908_v61  ;;  %v1860_v2 = vsub.f32 %v3852_v57, %v1830_v52  ;;  %v1861_v3 = vsub.f32 %v3856_v59, %v1830_v52  ;;  %v1862_v18 = vsub.f32 %v3854_v58, %v1830_v52 }
 0x33f   :  { %v3933_v27 = vpop.eup %3447  ;;  %3467 = vpow2.f32 %v1910_v11  ;;  %v1863_v19 = vsub.f32 %v3858_v60, %v1830_v52  ;;  %v1939_v20 = vadd.f32 %v3917_v7, %v1938_v14  ;;  %v1942_v23 = vadd.f32 %v3925_v12, %v3923_v56 }
 0x340   :  { %v3939_v0 = vpop.eup %3449  ;;  %3469 = vpow2.f32 %v1912_v50  ;;  %v1916_v63 = vmul.f32 1.442695, %v1860_v2  ;;  %v1918_v1 = vmul.f32 1.442695, %v1861_v3  ;;  %v1920_v57 = vmul.f32 1.442695, %v1862_v18 }
 0x341   :  { %v3941_v29 = vpop.eup %3451  ;;  %3471 = vpow2.f32 %v1914_v51  ;;  %v1922_v58 = vmul.f32 1.442695, %v1863_v19  ;;  %1940 = vadd.xlane.f32.xlu1 %v1939_v20  ;;  %v1835_v59 = vpop.xlane.xlu1 %1834  ;;  %v1943_v34 = vadd.f32 %v3928_v53, %v1942_v23 }
 0x342   :  { %v3944_v60 = vpop.eup %3453  ;;  %3473 = vpow2.f32 %v1916_v63  ;;  %v1864_v30 = vsub.f32 %v3864_v8, %v1835_v59  ;;  %v1865_v32 = vsub.f32 %v3868_v10, %v1835_v59  ;;  %v1866_v31 = vsub.f32 %v3866_v9, %v1835_v59 }
 0x343   :  { %v3949_v33 = vpop.eup %3455  ;;  %3475 = vpow2.f32 %v1918_v1  ;;  %v1867_v5 = vsub.f32 %v3870_v16, %v1835_v59  ;;  %v1944_v6 = vadd.f32 %v3933_v27, %v1943_v34  ;;  %v1947_v36 = vadd.f32 %v3941_v29, %v3939_v0 }
 0x344   :  { %v3955_v54 = vpop.eup %3457  ;;  %3477 = vpow2.f32 %v1920_v57  ;;  %v1924_v55 = vmul.f32 1.442695, %v1864_v30  ;;  %v1926_v61 = vmul.f32 1.442695, %v1865_v32  ;;  %v1928_v10 = vmul.f32 1.442695, %v1866_v31 }
 0x345   :  { %v3957_v8 = vpop.eup %3459  ;;  %3479 = vpow2.f32 %v1922_v58  ;;  %1945 = vadd.xlane.f32.xlu0 %v1944_v6  ;;  %v1948_v9 = vadd.f32 %v3944_v60, %v1947_v36  ;;  %v1930_v51 = vmul.f32 1.442695, %v1867_v5 }
 0x346   :  { %v3960_v11 = vpop.eup %3461  ;;  %3481 = vpow2.f32 %v1924_v55  ;;  %v1952_v16 = vadd.f32 %v3957_v8, %v3955_v54 }
 0x347   :  { %v3964_v50 = vpop.eup %3463  ;;  %3483 = vpow2.f32 %v1926_v61  ;;  %v1949_v52 = vadd.f32 %v3949_v33, %v1948_v9 }
 0x348   :  { %v3967_v14 = vpop.eup %3465  ;;  %v1953_v2 = vadd.f32 %v3960_v11, %v1952_v16  ;;  %3485 = vpow2.f32 %v1928_v10 }
 0x349   :  { %v3970_v3 = vpop.eup %3467  ;;  %1950 = vadd.xlane.f32.xlu1 %v1949_v52  ;;  %3487 = vpow2.f32 %v1930_v51 }
 0x34a   :  { %v3972_v18 = vpop.eup %3469  ;;  %v1954_v19 = vadd.f32 %v3964_v50, %v1953_v2  ;;  %v1957_v20 = vadd.f32 %v3970_v3, %v3967_v14 }
 0x34b   :  { %v3977_v23 = vpop.eup %3471 }
 0x34c   :  { %v3979_v63 = vpop.eup %3473  ;;  %1955 = vadd.xlane.f32.xlu0 %v1954_v19  ;;  %v1958_v1 = vadd.f32 %v3972_v18, %v1957_v20 }
 0x34d   :  { %v3982_v57 = vpop.eup %3475 }
 0x34e   :  { %v3984_v58 = vpop.eup %3477  ;;  %v1959_v59 = vadd.f32 %v3977_v23, %v1958_v1  ;;  %v1962_v34 = vadd.f32 %v3982_v57, %v3979_v63 }
 0x34f   :  { %v3989_v30 = vpop.eup %3479 }
 0x350   :  { %v3991_v32 = vpop.eup %3481  ;;  %1960 = vadd.xlane.f32.xlu1 %v1959_v59  ;;  %v1963_v31 = vadd.f32 %v3984_v58, %v1962_v34 }
 0x351   :  { %v3994_v5 = vpop.eup %3483 }
 0x352   :  { %v1964_v6 = vadd.f32 %v3989_v30, %v1963_v31  ;;  %v1967_v36 = vadd.f32 %v3994_v5, %v3991_v32  ;;  %v3999_v55 = vpop.eup %3485 }
 0x353   :  { %v4002_v10 = vpop.eup %3487 }
 0x354   :  { %1965 = vadd.xlane.f32.xlu0 %v1964_v6  ;;  %v1968_v61 = vadd.f32 %v3999_v55, %v1967_v36 }
 0x356   :  { %v1969_v9 = vadd.f32 %v4002_v10, %v1968_v61 }
 0x358   :  { %1970 = vadd.xlane.f32.xlu1 %v1969_v9 }
 0x3ca   :  { %v1936_v16 = vpop.xlane.xlu0 %1935 }
 0x3cb   :  { %3489 = vrcp.f32 %v1936_v16 }
 0x3ce   :  { %v1941_v51 = vpop.xlane.xlu1 %1940 }
 0x3cf   :  { %3491 = vrcp.f32 %v1941_v51 }
 0x3d2   :  { %v1946_v52 = vpop.xlane.xlu0 %1945 }
 0x3d3   :  { %3493 = vrcp.f32 %v1946_v52 }
 0x3d5   :  { %v3490_v19 = vpop.eup %3489 }
 0x3d6   :  { %v1951_v2 = vpop.xlane.xlu1 %1950  ;;  %v4015_v6 = vmul.f32 %v3490_v19, %v3895_v17  ;;  %v4018_v9 = vmul.f32 %v3490_v19, %v3902_v24  ;;  %v4021_v16 = vmul.f32 %v3490_v19, %v3893_v13 }
 0x3d7   :  { %3495 = vrcp.f32 %v1951_v2 }
 0x3d9   :  { %v3492_v20 = vpop.eup %3491  ;;  %v1956_v1 = vpop.xlane.xlu0 %1955 }
 0x3da   :  { %3497 = vrcp.f32 %v1956_v1  ;;  %v4006_v59 = vmul.f32 %v3492_v20, %v3909_v35  ;;  %v4009_v34 = vmul.f32 %v3492_v20, %v3917_v7  ;;  %v4012_v31 = vmul.f32 %v3492_v20, %v3907_v28 }
 0x3db   :  { %v4024_v35 = vmul.f32 %v3490_v19, %v3897_v62  ;;  %v4027_v7 = vmul.f32 %v3492_v20, %v3912_v4 }
 0x3dc   :  { %v2021_v13 = vadd.f32 %v4006_v59, %v4015_v6  ;;  %v2039_v62 = vadd.f32 %v4009_v34, %v4018_v9  ;;  %v2012_v24 = vadd.f32 %v4012_v31, %v4021_v16 }
 0x3dd   :  { %v3494_v36 = vpop.eup %3493  ;;  %v1961_v61 = vpop.xlane.xlu1 %1960  ;;  %v2030_v19 = vadd.f32 %v4027_v7, %v4024_v35 }
 0x3de   :  { %3499 = vrcp.f32 %v1961_v61  ;;  %v4030_v28 = vmul.f32 %v3494_v36, %v3925_v12  ;;  %v4033_v17 = vmul.f32 %v3494_v36, %v3933_v27  ;;  %v4036_v51 = vmul.f32 %v3494_v36, %v3923_v56 }
 0x3df   :  { %v4045_v4 = vmul.f32 %v3494_v36, %v3928_v53 }
 0x3e0   :  { %v2022_v27 = vadd.f32 %v2021_v13, %v4030_v28  ;;  %v2040_v2 = vadd.f32 %v2039_v62, %v4033_v17  ;;  %v2013_v56 = vadd.f32 %v2012_v24, %v4036_v51 }
 0x3e1   :  { %v3496_v12 = vpop.eup %3495  ;;  %v1966_v52 = vpop.xlane.xlu0 %1965  ;;  %v2031_v61 = vadd.f32 %v2030_v19, %v4045_v4 }
 0x3e2   :  { %3501 = vrcp.f32 %v1966_v52  ;;  %v4053_v20 = vmul.f32 %v3496_v12, %v3941_v29  ;;  %v4056_v1 = vmul.f32 %v3496_v12, %v3949_v33  ;;  %v4059_v53 = vmul.f32 %v3496_v12, %v3939_v0 }
 0x3e3   :  { %v4062_v36 = vmul.f32 %v3496_v12, %v3944_v60 }
 0x3e4   :  { %v3498_v13 = vpop.eup %3497  ;;  %v2023_v62 = vadd.f32 %v2022_v27, %v4053_v20  ;;  %v2041_v24 = vadd.f32 %v2040_v2, %v4056_v1  ;;  %v2014_v52 = vadd.f32 %v2013_v56, %v4059_v53 }
 0x3e5   :  { %v1971_v29 = vpop.xlane.xlu1 %1970  ;;  %v2032_v46 = vadd.f32 %v2031_v61, %v4062_v36  ;;  %v4070_v60 = vmul.f32 %v3498_v13, %v3957_v8  ;;  %v4073_v12 = vmul.f32 %v3498_v13, %v3964_v50  ;;  %v4076_v27 = vmul.f32 %v3498_v13, %v3955_v54 }
 0x3e6   :  { %3503 = vrcp.f32 %v1971_v29  ;;  %v2024_v33 = vrot.slane %v2023_v62, 4  ;;  %v2042_v44 = vrot.slane %v2041_v24, 4  ;;  %v2015_v0 = vrot.slane %v2014_v52, 4 }
 0x3e7   :  { %v2033_v42 = vrot.slane %v2032_v46, 4  ;;  %v4079_v61 = vmul.f32 %v3498_v13, %v3960_v11 }
 0x3e8   :  { %v3500_v2 = vpop.eup %3499  ;;  %v2025_v19 = vadd.f32 %v2024_v33, %v2023_v62  ;;  %v2043_v56 = vadd.f32 %v2042_v44, %v2041_v24  ;;  %v2016_v41 = vadd.f32 %v2015_v0, %v2014_v52 }
 0x3e9   :  { %v2034_v29 = vadd.f32 %v2033_v42, %v2032_v46  ;;  %v4082_v45 = vmul.f32 %v3500_v2, %v3970_v3  ;;  %v4085_v8 = vmul.f32 %v3500_v2, %v3977_v23  ;;  %v4088_v50 = vmul.f32 %v3500_v2, %v3967_v14 }
 0x3ea   :  { %v2026_v43 = vrot.slane %v2025_v19, 2  ;;  %v2044_v54 = vrot.slane %v2043_v56, 2  ;;  %v2017_v49 = vrot.slane %v2016_v41, 2  ;;  %v4091_v62 = vmul.f32 %v3500_v2, %v3972_v18 }
 0x3eb   :  { %v2035_v44 = vrot.slane %v2034_v29, 2  ;;  %v2057_v11 = vadd.f32 %v4082_v45, %v4070_v60  ;;  %v2075_v42 = vadd.f32 %v4085_v8, %v4073_v12  ;;  %v2048_v46 = vadd.f32 %v4088_v50, %v4076_v27 }
 0x3ec   :  { %v3502_v3 = vpop.eup %3501  ;;  %v2027_v23 = vadd.f32 %v2026_v43, %v2025_v19  ;;  %v2045_v14 = vadd.f32 %v2044_v54, %v2043_v56  ;;  %v2018_v13 = vadd.f32 %v2017_v49, %v2016_v41  ;;  %v2066_v24 = vadd.f32 %v4091_v62, %v4079_v61 }
 0x3ed   :  { %v2036_v52 = vadd.f32 %v2035_v44, %v2034_v29  ;;  %v4102_v18 = vmul.f32 %v3502_v3, %v3982_v57  ;;  %v4105_v33 = vmul.f32 %v3502_v3, %v3989_v30  ;;  %v4108_v0 = vmul.f32 %v3502_v3, %v3979_v63 }
 0x3ee   :  { %v2028_v2 = vrot.slane %v2027_v23, 1  ;;  %v2046_v48 = vrot.slane %v2045_v14, 1  ;;  %v2019_v15 = vrot.slane %v2018_v13, 1  ;;  %v4111_v43 = vmul.f32 %v3502_v3, %v3984_v58 }
 0x3ef   :  { %v2037_v41 = vrot.slane %v2036_v52, 1  ;;  %v2058_v49 = vadd.f32 %v2057_v11, %v4102_v18  ;;  %v2076_v19 = vadd.f32 %v2075_v42, %v4105_v33  ;;  %v2049_v57 = vadd.f32 %v2048_v46, %v4108_v0 }
 0x3f0   :  { %v3504_v56 = vpop.eup %3503  ;;  %v2029_v29 = vadd.f32 %v2028_v2, %v2027_v23  ;;  %v2047_v30 = vadd.f32 %v2046_v48, %v2045_v14  ;;  %v2020_v54 = vadd.f32 %v2019_v15, %v2018_v13  ;;  %v2067_v63 = vadd.f32 %v2066_v24, %v4111_v43 }
 0x3f1   :  { %v2038_v44 = vadd.f32 %v2037_v41, %v2036_v52  ;;  %v4118_v47 = vmul.f32 %v3504_v56, %v3994_v5  ;;  %v4121_v58 = vmul.f32 %v3504_v56, %v4002_v10  ;;  %v4124_v3 = vmul.f32 %v3504_v56, %v3991_v32 }
 0x3f2   :  { %v2085_v11 = vadd.f32 1e-09, %v2029_v29  ;;  %v2087_v42 = vadd.f32 1e-09, %v2047_v30  ;;  %v2084_v40 = vadd.f32 1e-09, %v2020_v54  ;;  %v4127_v46 = vmul.f32 %v3504_v56, %v3999_v55 }
 0x3f3   :  { %v2086_v48 = vadd.f32 1e-09, %v2038_v44  ;;  %v2059_v15 = vadd.f32 %v2058_v49, %v4118_v47  ;;  %v2077_v23 = vadd.f32 %v2076_v19, %v4121_v58  ;;  %v2050_v5 = vadd.f32 %v2049_v57, %v4124_v3 }
 0x3f4   :  { %3505 = vrcp.f32 %v2085_v11  ;;  %v2068_v10 = vadd.f32 %v2067_v63, %v4127_v46 }
 0x3f5   :  { %3507 = vrcp.f32 %v2087_v42  ;;  %v2060_v14 = vrot.slane %v2059_v15, 4  ;;  %v2078_v32 = vrot.slane %v2077_v23, 4  ;;  %v2051_v13 = vrot.slane %v2050_v5, 4 }
 0x3f6   :  { %3509 = vrcp.f32 %v2084_v40  ;;  %v2069_v24 = vrot.slane %v2068_v10, 4 }
 0x3f7   :  { %3511 = vrcp.f32 %v2086_v48  ;;  %v2061_v52 = vadd.f32 %v2060_v14, %v2059_v15  ;;  %v2079_v55 = vadd.f32 %v2078_v32, %v2077_v23  ;;  %v2052_v2 = vadd.f32 %v2051_v13, %v2050_v5 }
 0x3f8   :  { %v2070_v41 = vadd.f32 %v2069_v24, %v2068_v10 }
 0x3f9   :  { %v2062_v56 = vrot.slane %v2061_v52, 2  ;;  %v2080_v49 = vrot.slane %v2079_v55, 2  ;;  %v2053_v29 = vrot.slane %v2052_v2, 2 }
 0x3fa   :  { %v2071_v19 = vrot.slane %v2070_v41, 2 }
 0x3fb   :  { %v2063_v30 = vadd.f32 %v2062_v56, %v2061_v52  ;;  %v2081_v57 = vadd.f32 %v2080_v49, %v2079_v55  ;;  %v2054_v54 = vadd.f32 %v2053_v29, %v2052_v2 }
 0x3fc   :  { %v2072_v44 = vadd.f32 %v2071_v19, %v2070_v41 }
 0x3fd   :  { %v2064_v11 = vrot.slane %v2063_v30, 1  ;;  %v2082_v42 = vrot.slane %v2081_v57, 1  ;;  %v2055_v39 = vrot.slane %v2054_v54, 1 }
 0x3fe   :  { %v3506_v63 = vpop.eup %3505  ;;  %v2073_v13 = vrot.slane %v2072_v44, 1 }
 0x3ff   :  { %v3508_v38 = vpop.eup %3507  ;;  %v2095_v40 = vmul.f32 %v3506_v63, %v4015_v6  ;;  %v2101_v48 = vmul.f32 %v3506_v63, %v4006_v59  ;;  %v2105_v15 = vmul.f32 %v3506_v63, %v4030_v28  ;;  %v2109_v23 = vmul.f32 %v3506_v63, %v4053_v20 }
 0x400   :  { %v3510_v5 = vpop.eup %3509  ;;  %v2099_v10 = vmul.f32 %v3508_v38, %v4018_v9  ;;  %v2103_v14 = vmul.f32 %v3508_v38, %v4009_v34  ;;  %v2107_v32 = vmul.f32 %v3508_v38, %v4033_v17  ;;  %v2111_v59 = vmul.f32 %v3508_v38, %v4056_v1 }
 0x401   :  { %v3512_v24 = vpop.eup %3511  ;;  %v3007_v52 = vpack.c.bf16 %v2101_v48, %v2095_v40  ;;  %v2093_v55 = vmul.f32 %v3510_v5, %v4021_v16  ;;  %v2100_v6 = vmul.f32 %v3510_v5, %v4012_v31  ;;  %v3011_v41 = vpack.c.bf16 %v2109_v23, %v2105_v15 }
 0x402   :  { %v3023_v2 = vpack.c.bf16 %v2103_v14, %v2099_v10  ;;  %v2097_v28 = vmul.f32 %v3512_v24, %v4024_v35  ;;  %v2102_v20 = vmul.f32 %v3512_v24, %v4027_v7  ;;  %v2104_v34 = vmul.f32 %v3510_v5, %v4036_v51 }
 0x403   :  { %3008 = vmatprep.subr.bf16.mxu0 %v3007_v52  ;;  %v3009_v9 = vpack.c.bf16 %v2100_v6, %v2093_v55  ;;  %v2108_v17 = vmul.f32 %v3510_v5, %v4059_v53  ;;  %v2106_v56 = vmul.f32 %v3512_v24, %v4045_v4  ;;  %v2110_v31 = vmul.f32 %v3512_v24, %v4062_v36 }
 0x404   :  { %3024 = vmatprep.subr.bf16.mxu1 %v3023_v2  ;;  %v3025_v16 = vpack.c.bf16 %v2102_v20, %v2097_v28  ;;  %v2065_v49 = vadd.f32 %v2064_v11, %v2063_v30  ;;  %v2083_v38 = vadd.f32 %v2082_v42, %v2081_v57  ;;  %v3027_v1 = vpack.c.bf16 %v2111_v59, %v2107_v32 }
 0x405   :  { %3010 = vmatpush1.bf16.msra.mxu0 %v3009_v9  ;;  %v2056_v35 = vadd.f32 %v2055_v39, %v2054_v54  ;;  %v2074_v29 = vadd.f32 %v2073_v13, %v2072_v44  ;;  %v3013_v51 = vpack.c.bf16 %v2108_v17, %v2104_v34  ;;  %v3029_v40 = vpack.c.bf16 %v2110_v31, %v2106_v56 }
 0x406   :  { %3026 = vmatpush1.bf16.msra.mxu1 %v3025_v16  ;;  %3012 = vmatprep.subr.bf16.mxu0 %v3011_v41  ;;  %v2089_v7 = vadd.f32 1e-09, %v2065_v49  ;;  %v2091_v19 = vadd.f32 1e-09, %v2083_v38  ;;  %v4441_v55 = vmax.f32 %v3673_v21, 0.0  ;;  %v4442_v59 = vmax.f32 %v3675_v22, 0.0 }
 0x407   :  { %3028 = vmatprep.subr.bf16.mxu1 %v3027_v1  ;;  %v2088_v63 = vadd.f32 1e-09, %v2056_v35  ;;  %v2090_v53 = vadd.f32 1e-09, %v2074_v29  ;;  %v4443_v28 = vmax.f32 %v3677_v25, 0.0  ;;  %v4444_v9 = vmax.f32 %v3679_v26, 0.0 }
 0x408   :  { %3513 = vrcp.f32 %v2089_v7  ;;  %v4445_v17 = vmax.f32 %v3681_v37, 0.0  ;;  %v4446_v49 = vld [vmem:[#allocation9_spill] sm:$0xff]  ;;  %v4448_v21 = vld [vmem:[#allocation10_spill] sm:$0xff]  ;;  %v4450_v25 = vld [vmem:[#allocation11_spill] sm:$0xff] }
 0x409   :  { %3014 = vmatpush1.bf16.msra.mxu0 %v3013_v51  ;;  %3515 = vrcp.f32 %v2091_v19  ;;  %v4447_v38 = vmax.f32 %v4446_v49, 0.0  ;;  %v4449_v35 = vmax.f32 %v4448_v21, 0.0  ;;  %v4451_v51 = vmax.f32 %v4450_v25, 0.0  ;;  %v2477_v26 = vld [vmem:[%s4416_s5 + $0x80] sm:$0xff]  ;;  %v2478_v37 = vld [vmem:[%s4416_s5 + $0x88] sm:$0xff]  ;;  %v2499_v21 = vld [vmem:[%s4416_s5 + $0x130] sm:$0xff] }
 0x40a   :  { %3030 = vmatpush1.bf16.msra.mxu1 %v3029_v40  ;;  %3517 = vrcp.f32 %v2088_v63  ;;  %v2518_v25 = vld [vmem:[%s4416_s5 + $0x1c8] sm:$0xff] }
 0x40b   :  { %3519 = vrcp.f32 %v2090_v53 }
 0x412   :  { %v3514_v4 = vpop.eup %3513 }
 0x413   :  { %v3516_v36 = vpop.eup %3515  ;;  %v2115_v39 = vmul.f32 %v3514_v4, %v4070_v60  ;;  %v2121_v30 = vmul.f32 %v3514_v4, %v4082_v45  ;;  %v2125_v57 = vmul.f32 %v3514_v4, %v4102_v18  ;;  %v2129_v42 = vmul.f32 %v3514_v4, %v4118_v47 }
 0x414   :  { %v3518_v54 = vpop.eup %3517  ;;  %v2119_v44 = vmul.f32 %v3516_v36, %v4073_v12  ;;  %v2123_v11 = vmul.f32 %v3516_v36, %v4085_v8  ;;  %v2127_v48 = vmul.f32 %v3516_v36, %v4105_v33  ;;  %v2131_v60 = vmul.f32 %v3516_v36, %v4121_v58 }
 0x415   :  { %v3520_v15 = vpop.eup %3519  ;;  %v3015_v23 = vpack.c.bf16 %v2121_v30, %v2115_v39  ;;  %v2113_v5 = vmul.f32 %v3518_v54, %v4076_v27  ;;  %v2120_v10 = vmul.f32 %v3518_v54, %v4088_v50  ;;  %v2124_v8 = vmul.f32 %v3518_v54, %v4108_v0  ;;  %v2132_v0 = vld [vmem:[%s4414_s3] sm:$0xff]  ;;  %v2510_v30 = vld [vmem:[%s4416_s5 + $0x188] sm:$0xff] }
 0x416   :  { %v3031_v45 = vpack.c.bf16 %v2123_v11, %v2119_v44  ;;  %v2117_v18 = vmul.f32 %v3520_v15, %v4079_v61  ;;  %v2122_v14 = vmul.f32 %v3520_v15, %v4091_v62  ;;  %v2128_v47 = vmul.f32 %v3518_v54, %v4124_v3  ;;  %v2509_v39 = vld [vmem:[%s4416_s5 + $0x180] sm:$0xff] }
 0x417   :  { %3016 = vmatprep.subr.bf16.mxu0 %v3015_v23  ;;  %v3017_v12 = vpack.c.bf16 %v2120_v10, %v2113_v5  ;;  %v3019_v32 = vpack.c.bf16 %v2129_v42, %v2125_v57  ;;  %v2126_v27 = vmul.f32 %v3520_v15, %v4111_v43  ;;  %v2130_v50 = vmul.f32 %v3520_v15, %v4127_v46  ;;  %v2133_v43 = vld [vmem:[%s4414_s3 + $0x8] sm:$0xf]  ;;  %v2461_v15 = vld [vmem:[%s4416_s5] sm:$0xff] }
 0x418   :  { %3032 = vmatprep.subr.bf16.mxu1 %v3031_v45  ;;  %v3033_v33 = vpack.c.bf16 %v2122_v14, %v2117_v18  ;;  %v3035_v58 = vpack.c.bf16 %v2131_v60, %v2127_v48  ;;  %v3021_v61 = vpack.c.bf16 %v2128_v47, %v2124_v8  ;;  %v4440_v3 = vmov 0.0   ;;  %v2462_v23 = vld [vmem:[%s4416_s5 + $0x8] sm:$0xff]  ;;  %v2493_v5 = vld [vmem:[%s4416_s5 + $0x100] sm:$0xff]  ;;  %v2479_v18 = vld [vmem:[%s4416_s5 + $0x90] sm:$0xff] }
 0x419   :  { %3018 = vmatpush1.bf16.msra.mxu0 %v3017_v12  ;;  %v3037_v62 = vpack.c.bf16 %v2130_v50, %v2126_v27  ;;  %v3051_v48 = vpack.c.bf16 %v2478_v37, %v2477_v26  ;;  %v3083_v60 = vpack.c.bf16 %v2510_v30, %v2509_v39  ;;  %v2494_v45 = vld [vmem:[%s4416_s5 + $0x108] sm:$0xff]  ;;  %v2480_v14 = vld [vmem:[%s4416_s5 + $0x98] sm:$0xff]  ;;  %v2511_v8 = vld [vmem:[%s4416_s5 + $0x190] sm:$0xff] }
 0x41a   :  { %3034 = vmatpush1.bf16.msra.mxu1 %v3033_v33  ;;  %3020 = vmatprep.subr.bf16.mxu0 %v3019_v32  ;;  %v2512_v47 = vld [vmem:[%s4416_s5 + $0x198] sm:$0xff]  ;;  %v2303_v33 = vld [vmem:[%s4415_s4] sm:$0x3]  ;;  %v3053_v32 = vpack.c.bf16 %v2462_v23, %v2461_v15  ;;  %v3085_v27 = vpack.c.bf16 %v2494_v45, %v2493_v5  ;;  %v3055_v50 = vpack.c.bf16 %v2480_v14, %v2479_v18  ;;  %v2487_v39 = vld [vmem:[%s4416_s5 + $0xd0] sm:$0xff] }
 0x41b   :  { %3036 = vmatprep.subr.bf16.mxu1 %v3035_v58  ;;  %v2463_v58 = vld [vmem:[%s4416_s5 + $0x10] sm:$0xff]  ;;  %v2469_v37 = vld [vmem:[%s4416_s5 + $0x40] sm:$0xff]  ;;  %v2488_v30 = vld [vmem:[%s4416_s5 + $0xd8] sm:$0xff] }
 0x41c   :  { %v2472_v15 = vld [vmem:[%s4416_s5 + $0x58] sm:$0xff]  ;;  %v2503_v23 = vld [vmem:[%s4416_s5 + $0x150] sm:$0xff]  ;;  %v2490_v45 = vld [vmem:[%s4416_s5 + $0xe8] sm:$0xff] }
 0x41d   :  { %3022 = vmatpush1.bf16.msra.mxu0 %v3021_v61  ;;  %v2464_v61 = vld [vmem:[%s4416_s5 + $0x18] sm:$0xff]  ;;  %v2521_v18 = vld [vmem:[%s4416_s5 + $0x1e0] sm:$0xff]  ;;  %v2522_v14 = vld [vmem:[%s4416_s5 + $0x1e8] sm:$0xff] }
 0x41e   :  { %3038 = vmatpush1.bf16.msra.mxu1 %v3037_v62  ;;  %v2495_v62 = vld [vmem:[%s4416_s5 + $0x110] sm:$0xff] }
 0x420   :  { %2914 = vmatmul.mubr.msk.f32.vlgmr.msra.gmra.mrb[20].mxu0 %vm2134_vm4, %v2132_v0 }
 0x421   :  { %2916 = vmatmul.mubr.msk.f32.vlgmr.msra.gmra.mrb[20].mxu1 %vm2134_vm4, %v2132_v0  ;;  %2211 = vmatprep.mubr.f32.mxu0 %v4440_v3  ;;  %v3087_v0 = vpack.c.bf16 %v2512_v47, %v2511_v8 }
 0x422   :  { %2288 = vmatprep.mubr.f32.mxu1 %v4440_v3 }
 0x424   :  { %2915 = vmatmul.mubr.msk.f32.gmra.mrb[22].mxu0 %vm2134_vm4, %v2133_v43 }
 0x425   :  { %2917 = vmatmul.mubr.msk.f32.gmra.mrb[22].mxu1 %vm2134_vm4, %v2133_v43  ;;  %2383 = vmatprep.mubr.f32.mxu0 %v4440_v3  ;;  %v2481_v43 = vld [vmem:[%s4416_s5 + $0xa0] sm:$0xff] }
 0x426   :  { %2454 = vmatprep.mubr.f32.mxu1 %v4440_v3  ;;  %v2496_v3 = vld [vmem:[%s4416_s5 + $0x118] sm:$0xff] }
 0x4f3   :  { %v2207_v46 = vpop.f32.mrb[20].mxu0 }
 0x4f4   :  { %v2284_v13 = vpop.f32.mrb[20].mxu1  ;;  %v2209_v24 = vpop.f32.mrb[21].mxu0  ;;  %v2208_v6 = vadd.f32 %v2207_v46, %v4441_v55  ;;  %v2482_v46 = vld [vmem:[%s4416_s5 + $0xa8] sm:$0xff]  ;;  %v3089_v55 = vpack.c.bf16 %v2496_v3, %v2495_v62  ;;  %v2492_v62 = vld [vmem:[%s4416_s5 + $0xf8] sm:$0xff] }
 0x4f5   :  { %v2286_v52 = vpop.f32.mrb[21].mxu1  ;;  %v2285_v2 = vadd.f32 %v2284_v13, %v4442_v59  ;;  %v2210_v20 = vadd.f32 %v2209_v24, %v4443_v28  ;;  %v2513_v13 = vld [vmem:[%s4416_s5 + $0x1a0] sm:$0xff]  ;;  %v2514_v24 = vld [vmem:[%s4416_s5 + $0x1a8] sm:$0xff] }
 0x4f6   :  { %v2287_v34 = vadd.f32 %v2286_v52, %v4444_v9  ;;  %v2295_v7 = vmax.f32 %v2208_v6, 0.0  ;;  %v3057_v52 = vpack.c.bf16 %v2464_v61, %v2463_v58  ;;  %v3059_v6 = vpack.c.bf16 %v2482_v46, %v2481_v43  ;;  %v2465_v59 = vld [vmem:[%s4416_s5 + $0x20] sm:$0xff]  ;;  %v2483_v9 = vld [vmem:[%s4416_s5 + $0xb0] sm:$0xff]  ;;  %v2506_v58 = vld [vmem:[%s4416_s5 + $0x168] sm:$0xff] }
 0x4f7   :  { %v2213_v41 = vpop.f32.mrb[22].mxu0  ;;  %v2297_v53 = vmax.f32 %v2285_v2, 0.0  ;;  %v2296_v40 = vmax.f32 %v2210_v20, 0.0  ;;  %v2466_v2 = vld [vmem:[%s4416_s5 + $0x28] sm:$0xff]  ;;  %v2497_v28 = vld [vmem:[%s4416_s5 + $0x120] sm:$0xff]  ;;  %v3091_v20 = vpack.c.bf16 %v2514_v24, %v2513_v13  ;;  %v2491_v61 = vld [vmem:[%s4416_s5 + $0xf0] sm:$0xff] }
 0x4f8   :  { %v2214_v56 = vadd.f32 %v2213_v41, %v4445_v17  ;;  %v2290_v16 = vpop.f32.mrb[22].mxu1  ;;  %v2215_v31 = vpop.f32.mrb[23].mxu0  ;;  %v2298_v57 = vmax.f32 %v2287_v34, 0.0  ;;  %v2498_v41 = vld [vmem:[%s4416_s5 + $0x128] sm:$0xff]  ;;  %v2484_v34 = vld [vmem:[%s4416_s5 + $0xb8] sm:$0xff]  ;;  %v2515_v17 = vld [vmem:[%s4416_s5 + $0x1b0] sm:$0xff]  ;;  %v3079_v43 = vpack.c.bf16 %v2492_v62, %v2491_v61 }
 0x4f9   :  { %v2291_v1 = vadd.f32 %v2290_v16, %v4447_v38  ;;  %v2216_v29 = vadd.f32 %v2215_v31, %v4449_v35  ;;  %v2292_v22 = vpop.f32.mrb[23].mxu1  ;;  %v3061_v16 = vpack.c.bf16 %v2466_v2, %v2465_v59  ;;  %v3093_v31 = vpack.c.bf16 %v2498_v41, %v2497_v28  ;;  %v2467_v38 = vld [vmem:[%s4416_s5 + $0x30] sm:$0xff]  ;;  %v2476_v13 = vld [vmem:[%s4416_s5 + $0x78] sm:$0xff] }
 0x4fa   :  { %v2299_v19 = vmax.f32 %v2214_v56, 0.0  ;;  %v2293_v63 = vadd.f32 %v2292_v22, %v4451_v51  ;;  %v2516_v56 = vld [vmem:[%s4416_s5 + $0x1b8] sm:$0xff]  ;;  %v3063_v49 = vpack.c.bf16 %v2484_v34, %v2483_v9  ;;  %v2485_v22 = vld [vmem:[%s4416_s5 + $0xc0] sm:$0xff]  ;;  %v2475_v46 = vld [vmem:[%s4416_s5 + $0x70] sm:$0xff] }
 0x4fb   :  { %v2301_v4 = vmax.f32 %v2291_v1, 0.0  ;;  %v2300_v36 = vmax.f32 %v2216_v29, 0.0  ;;  %v2468_v1 = vld [vmem:[%s4416_s5 + $0x38] sm:$0xff]  ;;  %v3095_v35 = vpack.c.bf16 %v2516_v56, %v2515_v17  ;;  %v2523_v24 = vld [vmem:[%s4416_s5 + $0x1f0] sm:$0xff]  ;;  %v2924_v56 = vld [vmem:[%s4417_s6] ss:$0 sm:$0xff] }
 0x4fc   :  { %v3042_v54 = vpack.c.bf16 %v2299_v19, %v2295_v7  ;;  %v2302_v44 = vmax.f32 %v2293_v63, 0.0  ;;  %v2500_v29 = vld [vmem:[%s4416_s5 + $0x138] sm:$0xff]  ;;  %v2486_v7 = vld [vmem:[%s4416_s5 + $0xc8] sm:$0xff]  ;;  %v2517_v19 = vld [vmem:[%s4416_s5 + $0x1c0] sm:$0xff]  ;;  %v3065_v51 = vpack.c.bf16 %v2468_v1, %v2467_v38 }
 0x4fd   :  { %v3048_v11 = vpack.c.bf16 %v2301_v4, %v2297_v53  ;;  %v3039_v42 = vpack.c.bf16 %v2300_v36, %v2296_v40  ;;  %v3097_v63 = vpack.c.bf16 %v2500_v29, %v2499_v21  ;;  %v3067_v26 = vpack.c.bf16 %v2486_v7, %v2485_v22  ;;  %v2470_v53 = vld [vmem:[%s4416_s5 + $0x48] sm:$0xff]  ;;  %v2501_v40 = vld [vmem:[%s4416_s5 + $0x140] sm:$0xff]  ;;  %v2508_v59 = vld [vmem:[%s4416_s5 + $0x178] sm:$0xff] }
 0x4fe   :  { %v3045_v10 = vpack.c.bf16 %v2302_v44, %v2298_v57  ;;  %v3099_v4 = vpack.c.bf16 %v2518_v25, %v2517_v19  ;;  %v2502_v36 = vld [vmem:[%s4416_s5 + $0x148] sm:$0xff]  ;;  %v2519_v57 = vld [vmem:[%s4416_s5 + $0x1d0] sm:$0xff]  ;;  %v3069_v44 = vpack.c.bf16 %v2470_v53, %v2469_v37 }
 0x4ff   :  { %3041 = vmatprep.subr.msk.bf16.mxu0 %vm3695_vm2, %v3039_v42  ;;  %v3071_v42 = vpack.c.bf16 %v2488_v30, %v2487_v39 }
 0x500   :  { %3047 = vmatprep.subr.msk.bf16.mxu1 %vm3695_vm2, %v3045_v10  ;;  %3044 = vmatpush1.bf16.msk.msra.mxu0 %vm3695_vm2, %v3042_v54  ;;  %v2520_v54 = vld [vmem:[%s4416_s5 + $0x1d8] sm:$0xff] }
 0x501   :  { %3050 = vmatpush1.bf16.msk.msra.mxu1 %vm3695_vm2, %v3048_v11  ;;  %3052 = vmatprep.subr.bf16.mxu0 %v3051_v48  ;;  %v3101_v11 = vpack.c.bf16 %v2502_v36, %v2501_v40  ;;  %v2471_v48 = vld [vmem:[%s4416_s5 + $0x50] sm:$0xff]  ;;  %v3103_v5 = vpack.c.bf16 %v2520_v54, %v2519_v57  ;;  %v2504_v10 = vld [vmem:[%s4416_s5 + $0x158] sm:$0xff] }
 0x502   :  { %3084 = vmatprep.subr.bf16.mxu1 %v3083_v60  ;;  %v2489_v60 = vld [vmem:[%s4416_s5 + $0xe0] sm:$0xff]  ;;  %v3073_v12 = vpack.c.bf16 %v2472_v15, %v2471_v48  ;;  %v3105_v8 = vpack.c.bf16 %v2504_v10, %v2503_v23 }
 0x503   :  { %2920 = vmatmul.mubr.msk.f32.vlgmr.msra.gmra.mrb[24].mxu0 %vm1532_vm3, %v2303_v33  ;;  %v3075_v47 = vpack.c.bf16 %v2490_v45, %v2489_v60 }
 0x504   :  { %2923 = vmatmul.mubr.msk.f32.vlgmr.msra.gmra.mrb[24].mxu1 %vm1532_vm3, %v2303_v33  ;;  %3054 = vmatpush3.bf16.msra.mxu0 %v3053_v32  ;;  %v2473_v33 = vld [vmem:[%s4416_s5 + $0x60] sm:$0xff]  ;;  %v2474_v32 = vld [vmem:[%s4416_s5 + $0x68] sm:$0xff] }
 0x505   :  { %3086 = vmatpush3.bf16.msra.mxu1 %v3085_v27  ;;  %3056 = vmatprep.subr.bf16.mxu0 %v3055_v50  ;;  %v2505_v27 = vld [vmem:[%s4416_s5 + $0x160] sm:$0xff]  ;;  %v3107_v50 = vpack.c.bf16 %v2522_v14, %v2521_v18 }
 0x506   :  { %3088 = vmatprep.subr.bf16.mxu1 %v3087_v0  ;;  %v3077_v0 = vpack.c.bf16 %v2474_v32, %v2473_v33  ;;  %v3109_v3 = vpack.c.bf16 %v2506_v58, %v2505_v27 }
 0x508   :  { %3058 = vmatpush3.bf16.msra.mxu0 %v3057_v52  ;;  %v3081_v52 = vpack.c.bf16 %v2476_v13, %v2475_v46 }
 0x509   :  { %3090 = vmatpush3.bf16.msra.mxu1 %v3089_v55  ;;  %3060 = vmatprep.subr.bf16.mxu0 %v3059_v6  ;;  %v2524_v55 = vld [vmem:[%s4416_s5 + $0x1f8] sm:$0xff]  ;;  %v2507_v6 = vld [vmem:[%s4416_s5 + $0x170] sm:$0xff]  ;;  %s3578_s5 = smov [#allocation6]  }
 0x50a   :  { %3092 = vmatprep.subr.bf16.mxu1 %v3091_v20  ;;  %v3111_v2 = vpack.c.bf16 %v2524_v55, %v2523_v24  ;;  %v3113_v28 = vpack.c.bf16 %v2508_v59, %v2507_v6  ;;  %s2693_s6 = sshll.u32 %s3578_s5, 4  ;;  %s2694_s6 = int_to_ptr.vmem [resolvable:$true] %s2693_s6 }
 0x50b   :  { %s3547_s26 = scalar_lea.vmem %s2694_s6, 32  ;;  %p3552_p9 = scmp.lt.s32.totalorder %s2694_s6, %s2694_s6 }
 0x50c   :  { %3062 = vmatpush3.bf16.msra.mxu0 %v3061_v16  ;;  %p3548_p8 = scmp.ne.s32.totalorder %s2694_s6, %s3547_s26  ;;  %p3553_p10 = scmp.lt.s32.totalorder %s3547_s26, %s3547_s26 }
 0x50d   :  { %3094 = vmatpush3.bf16.msra.mxu1 %v3093_v31  ;;  %3064 = vmatprep.subr.bf16.mxu0 %v3063_v49 }
 0x50e   :  { %3096 = vmatprep.subr.bf16.mxu1 %v3095_v35  ;;  %p3554_p11 = por %p3553_p10, %p3552_p9 }
 0x510   :  { %3066 = vmatpush3.bf16.msra.mxu0 %v3065_v51  ;;  %p3555_p12 = pnand %p3554_p11, %p3548_p8 }
 0x511   :  { %3098 = vmatpush3.bf16.msra.mxu1 %v3097_v63  ;;  %3068 = vmatprep.subr.bf16.mxu0 %v3067_v26 }
 0x512   :  { %3100 = vmatprep.subr.bf16.mxu1 %v3099_v4 }
 0x514   :  { %3070 = vmatpush3.bf16.msra.mxu0 %v3069_v44 }
 0x515   :  { %3102 = vmatpush3.bf16.msra.mxu1 %v3101_v11  ;;  %3072 = vmatprep.subr.bf16.mxu0 %v3071_v42 }
 0x516   :  { %3104 = vmatprep.subr.bf16.mxu1 %v3103_v5 }
 0x518   :  { %3074 = vmatpush3.bf16.msra.mxu0 %v3073_v12 }
 0x519   :  { %3106 = vmatpush3.bf16.msra.mxu1 %v3105_v8  ;;  %3076 = vmatprep.subr.bf16.mxu0 %v3075_v47 }
 0x51a   :  { %3108 = vmatprep.subr.bf16.mxu1 %v3107_v50 }
 0x51c   :  { %3078 = vmatpush3.bf16.msra.mxu0 %v3077_v0 }
 0x51d   :  { %3110 = vmatpush3.bf16.msra.mxu1 %v3109_v3  ;;  %3080 = vmatprep.subr.bf16.mxu0 %v3079_v43 }
 0x51e   :  { %3112 = vmatprep.subr.bf16.mxu1 %v3111_v2 }
 0x520   :  { %3082 = vmatpush3.bf16.msra.mxu0 %v3081_v52 }
 0x521   :  { %3114 = vmatpush3.bf16.msra.mxu1 %v3113_v28 }
 0x5d6   :  { %v2385_v20 = vpop.f32.mrb[24].mxu0 }
 0x5d7   :  { %v2387_v41 = vpop.f32.mrb[25].mxu0  ;;  %v2456_v9 = vpop.f32.mrb[24].mxu1 }
 0x5d8   :  { %2596 = vmatprep.mubr.f32.mxu0 %v2387_v41  ;;  %v2458_v34 = vpop.f32.mrb[25].mxu1 }
 0x5d9   :  { %2597 = vmatmul.mubr.f32.vlgmr.msra.gmra.mrb[26].mxu0 %v2385_v20  ;;  %2666 = vmatprep.mubr.f32.mxu1 %v2458_v34 }
 0x5da   :  { %2667 = vmatmul.mubr.f32.vlgmr.msra.gmra.mrb[26].mxu1 %v2456_v9 }
 0x6ac   :  { %v2957_v17 = vpop.f32.mrb[26].mxu0 }
 0x6ad   :  { %v2958_v16 = vpop.f32.mrb[27].mxu0  ;;  %v2992_v31 = vpop.f32.mrb[26].mxu1 }
 0x6ae   :  { %v2959_v49 = vadd.f32 %v2958_v16, %v2957_v17  ;;  %v2993_v38 = vpop.f32.mrb[27].mxu1 }
 0x6af   :  { %v2994_v1 = vadd.f32 %v2993_v38, %v2992_v31 }
 0x6b0   :  { %v2599_v21 = vadd.f32 %v2959_v49, %v2924_v56 }
 0x6b2   :  { %v2669_v35 = vadd.f32 %v2994_v1, %v2599_v21 }
 0x6b4   :  { %v2673_v29 = vsel %vm2672_vm5, %v2669_v35, -inf }
 0x6b5   :  { %2674 = vmax.xlane.f32.xlu0 %v2673_v29 }
 0x742   :  { %v2675_v22 = vpop.xlane.xlu0 %2674 }
 0x743   :  { %v2676_v7 = vsub.f32 %v2669_v35, %v2675_v22 }
 0x745   :  { %v2677_v19 = vmul.f32 1.442695, %v2676_v7 }
 0x747   :  { %3521 = vpow2.f32 %v2677_v19 }
 0x751   :  { %v3522_v25 = vpop.eup %3521 }
 0x752   :  { %v2679_v51 = vsel %vm2672_vm5, %v3522_v25, 0.0 }
 0x753   :  { %2680 = vadd.xlane.f32.xlu1 %v2679_v51 }
 0x7e0   :  { %v2681_v63 = vpop.xlane.xlu1 %2680 }
 0x7e1   :  { %3523 = vlog2.f32 %v2681_v63 }
 0x7eb   :  { %v3524_v26 = vpop.eup %3523 }
 0x7ec   :  { %v2683_v37 = vmul.f32 0.6931472, %v3524_v26 }
 0x7ee   :  { %v2684_v53 = vadd.f32 %v2683_v37, %v2675_v22 }
 0x7f0   :  { %v2685_v40 = vsub.f32 %v2669_v35, %v2684_v53 }
 0x7f2   :  { %2686 = vst [vmem:[#allocation6] sm:$0x3] %v2685_v40 }
 0x7f3   :  { %3558 = shalt.err (!%p3555_p12)
}
 0x7f4   :  { %s3559_s2 = scalar_lea.hbm %s4418_s7, 32 }
 0x7f5   :  { %p3560_p13 = scmp.ne.s32.totalorder %s4418_s7, %s3559_s2  ;;  %p3563_p0 = scmp.lt.u32.totalorder %s3559_s2, %s4418_s7 }
 0x7f7   :  { %p3565_p1 = pnand %p3563_p0, %p3560_p13 }
 0x7f9   :  { %3568 = shalt.err (!%p3565_p1)
}
 0x7fa   :  { %2696 = dma.vmem_to_hbm [thread:$0]  %s2694_s6, 32, %s4418_s7, [#allocation5]  }
 0x7fb   :  { %3571 = dma.done.wait [#allocation5], 32  }
 0x7fc   :  { %3572 = vsyncadd [#allocation5], 4294967264 }
 0x7fd   :  { %2700 = vsyncpa [#allocation4], 1 }
 0x7fe   :  { %2701 = vsyncpa [#allocation5], 1 }

</bundles_post_ra>
